<compile_context>
chip_gen: v6e
topology: v6e:2x2x1
jax: 0.10.0
libtpu: 0.0.40
codegen_flags: <defaults>
</compile_context>

<pallas_src>
import jax
import jax.numpy as jnp
from jax.experimental import pallas as pl
from jax.experimental.pallas import tpu as pltpu

# ----------------------------------------------------------------------------
# Synthetic "pconf": two parts chained like SubNetworkCollector.parts
#   gen : Linear(F_IN -> H) + ReLU, Linear(H -> H) + ReLU
#   disc: Linear(H -> F_OUT)            (no activation)
# ----------------------------------------------------------------------------
B      = 1024   # batch (multi-tile grid so v7x can use both TensorCores)
F_IN   = 128    # input features   (lane-dense: multiple of 128)
H      = 256    # hidden features  (fills a 256-wide MXU pass on v6e/v7x)
F_OUT  = 128    # output features  (lane-dense output slab -> unmasked vst)
TB     = 256    # batch tile (amortizes ~0.35us per-grid-step overhead)


def collector_kernel(x_ref, w1_ref, b1_ref, w2_ref, b2_ref, w3_ref, b3_ref,
                     o_ref):
    """Fused sequential forward of all sub-networks for one batch tile."""
    x = x_ref[...]                                                   # bf16
    # part "gen": layer 1 — bf16 MXU, f32 accumulate; bias+ReLU in f32
    h = jnp.dot(x, w1_ref[...], preferred_element_type=jnp.float32)
    h = jnp.maximum(h + b1_ref[...], 0.0)
    h = h.astype(jnp.bfloat16)                       # bf16 at layer boundary
    # part "gen": layer 2
    h = jnp.dot(h, w2_ref[...], preferred_element_type=jnp.float32)
    h = jnp.maximum(h + b2_ref[...], 0.0)
    h = h.astype(jnp.bfloat16)
    # part "disc": layer 3 (no activation)
    h = jnp.dot(h, w3_ref[...], preferred_element_type=jnp.float32)
    h = h + b3_ref[...]
    o_ref[...] = h.astype(o_ref.dtype)


def subnetwork_collector_forward(x, params):
    """Wrapper: tiles the batch and runs the fused chain kernel."""
    w1, b1, w2, b2, w3, b3 = params
    grid = (B // TB,)

    # Grid-invariant weight/bias blocks (same block for every grid step).
    full = lambda shape: pl.BlockSpec(shape, lambda i: (0, 0))

    flops = 2 * B * (F_IN * H + H * H + H * F_OUT)
    bytes_accessed = (
        B * F_IN * 2                                   # x (bf16)
        + (F_IN * H + H * H + H * F_OUT) * 2           # weights (bf16)
        + (H + H + F_OUT) * 4                          # biases (f32)
        + B * F_OUT * 4                                # output (f32)
    )

    return pl.pallas_call(
        collector_kernel,
        out_shape=jax.ShapeDtypeStruct((B, F_OUT), jnp.float32),
        grid=grid,
        in_specs=[
            pl.BlockSpec((TB, F_IN), lambda i: (i, 0)),   # x tile
            full((F_IN, H)), full((1, H)),                # gen layer 1
            full((H, H)),    full((1, H)),                # gen layer 2
            full((H, F_OUT)), full((1, F_OUT)),           # disc layer
        ],
        out_specs=pl.BlockSpec((TB, F_OUT), lambda i: (i, 0)),
        compiler_params=pltpu.CompilerParams(
            dimension_semantics=("parallel",)),
        cost_estimate=pl.CostEstimate(
            flops=flops, transcendentals=0, bytes_accessed=bytes_accessed),
    )(x, w1, b1, w2, b2, w3, b3)


def init_params(key):
    """Deterministic parameter init (shapes implied by the synthetic pconf).

    Weights are bf16 (MXU operands); biases stay f32 (added post-accumulate).
    """
    ks = jax.random.split(key, 6)
    w1 = (jax.random.normal(ks[0], (F_IN, H), jnp.float32) * 0.1
          ).astype(jnp.bfloat16)
    b1 = jax.random.normal(ks[1], (1, H), jnp.float32) * 0.01
    w2 = (jax.random.normal(ks[2], (H, H), jnp.float32) * 0.1
          ).astype(jnp.bfloat16)
    b2 = jax.random.normal(ks[3], (1, H), jnp.float32) * 0.01
    w3 = (jax.random.normal(ks[4], (H, F_OUT), jnp.float32) * 0.1
          ).astype(jnp.bfloat16)
    b3 = jax.random.normal(ks[5], (1, F_OUT), jnp.float32) * 0.01
    return (w1, b1, w2, b2, w3, b3)


def reference_forward(x, params):
    """Pure-JAX reference of the same sequential chain (same dtype pattern)."""
    w1, b1, w2, b2, w3, b3 = params
    h = jnp.dot(x, w1, preferred_element_type=jnp.float32)
    h = jnp.maximum(h + b1, 0.0).astype(jnp.bfloat16)
    h = jnp.dot(h, w2, preferred_element_type=jnp.float32)
    h = jnp.maximum(h + b2, 0.0).astype(jnp.bfloat16)
    return jnp.dot(h, w3, preferred_element_type=jnp.float32) + b3


if __name__ == "__main__":
    key = jax.random.PRNGKey(0)
    kx, kp = jax.random.split(key)
    x = jax.random.normal(kx, (B, F_IN), jnp.float32).astype(jnp.bfloat16)
    params = init_params(kp)

    out = subnetwork_collector_forward(x, params)
    out = jax.block_until_ready(out)

    ref = reference_forward(x, params)
    assert out.shape == (B, F_OUT)
    assert jnp.allclose(out, ref, atol=2e-2, rtol=2e-2)

    print("KERNEL_OK")
</pallas_src>

<mosaic_0001>
module attributes {stable_mosaic.version = 11 : i64} {
  func.func @collector_kernel(%arg0: i32, %arg1: memref<256x128xbf16, #tpu.memory_space<vmem>>, %arg2: memref<128x256xbf16, #tpu.memory_space<vmem>>, %arg3: memref<1x256xf32, #tpu.memory_space<vmem>>, %arg4: memref<256x256xbf16, #tpu.memory_space<vmem>>, %arg5: memref<1x256xf32, #tpu.memory_space<vmem>>, %arg6: memref<256x128xbf16, #tpu.memory_space<vmem>>, %arg7: memref<1x128xf32, #tpu.memory_space<vmem>>, %arg8: memref<256x128xf32, #tpu.memory_space<vmem>>) attributes {dimension_semantics = [#tpu.dimension_semantics<parallel>], iteration_bounds = array<i64: 4>, scalar_prefetch = 0 : i64, scratch_operands = 0 : i64, tpu.core_type = #tpu.core_type<tc>, window_params = [{transform_indices = @transform_0, window_bounds = array<i64: 256, 128>}, {pipeline_mode = #tpu.pipeline_mode<synchronous>, transform_indices = @transform_1, window_bounds = array<i64: 128, 256>}, {pipeline_mode = #tpu.pipeline_mode<synchronous>, transform_indices = @transform_2, window_bounds = array<i64: 1, 256>}, {pipeline_mode = #tpu.pipeline_mode<synchronous>, transform_indices = @transform_3, window_bounds = array<i64: 256, 256>}, {pipeline_mode = #tpu.pipeline_mode<synchronous>, transform_indices = @transform_4, window_bounds = array<i64: 1, 256>}, {pipeline_mode = #tpu.pipeline_mode<synchronous>, transform_indices = @transform_5, window_bounds = array<i64: 256, 128>}, {pipeline_mode = #tpu.pipeline_mode<synchronous>, transform_indices = @transform_6, window_bounds = array<i64: 1, 128>}, {transform_indices = @transform_7, window_bounds = array<i64: 256, 128>}]} {
    %c0 = arith.constant 0 : index
    %c0_0 = arith.constant 0 : index
    %0 = vector.load %arg1[%c0, %c0_0] : memref<256x128xbf16, #tpu.memory_space<vmem>>, vector<256x128xbf16>
    %c0_1 = arith.constant 0 : index
    %c0_2 = arith.constant 0 : index
    %1 = vector.load %arg2[%c0_1, %c0_2] : memref<128x256xbf16, #tpu.memory_space<vmem>>, vector<128x256xbf16>
    %cst = arith.constant dense<0.000000e+00> : vector<256x256xf32>
    %2 = tpu.matmul %0, %1, %cst {dimension_numbers = #tpu.dot_dimension_numbers<[1], [0], [0], [1], [0, 0, 1, 1], [], []>} : vector<256x128xbf16>, vector<128x256xbf16>, vector<256x256xf32> -> vector<256x256xf32>
    %c0_3 = arith.constant 0 : index
    %c0_4 = arith.constant 0 : index
    %3 = vector.load %arg3[%c0_3, %c0_4] : memref<1x256xf32, #tpu.memory_space<vmem>>, vector<1x256xf32>
    %4 = vector.broadcast %3 : vector<1x256xf32> to vector<256x256xf32>
    %5 = arith.addf %2, %4 : vector<256x256xf32>
    %cst_5 = arith.constant 0.000000e+00 : f32
    %6 = vector.broadcast %cst_5 : f32 to vector<256x256xf32>
    %7 = arith.maximumf %5, %6 : vector<256x256xf32>
    %8 = arith.truncf %7 : vector<256x256xf32> to vector<256x256xbf16>
    %c0_6 = arith.constant 0 : index
    %c0_7 = arith.constant 0 : index
    %9 = vector.load %arg4[%c0_6, %c0_7] : memref<256x256xbf16, #tpu.memory_space<vmem>>, vector<256x256xbf16>
    %cst_8 = arith.constant dense<0.000000e+00> : vector<256x256xf32>
    %10 = tpu.matmul %8, %9, %cst_8 {dimension_numbers = #tpu.dot_dimension_numbers<[1], [0], [0], [1], [0, 0, 1, 1], [], []>} : vector<256x256xbf16>, vector<256x256xbf16>, vector<256x256xf32> -> vector<256x256xf32>
    %c0_9 = arith.constant 0 : index
    %c0_10 = arith.constant 0 : index
    %11 = vector.load %arg5[%c0_9, %c0_10] : memref<1x256xf32, #tpu.memory_space<vmem>>, vector<1x256xf32>
    %12 = vector.broadcast %11 : vector<1x256xf32> to vector<256x256xf32>
    %13 = arith.addf %10, %12 : vector<256x256xf32>
    %cst_11 = arith.constant 0.000000e+00 : f32
    %14 = vector.broadcast %cst_11 : f32 to vector<256x256xf32>
    %15 = arith.maximumf %13, %14 : vector<256x256xf32>
    %16 = arith.truncf %15 : vector<256x256xf32> to vector<256x256xbf16>
    %c0_12 = arith.constant 0 : index
    %c0_13 = arith.constant 0 : index
    %17 = vector.load %arg6[%c0_12, %c0_13] : memref<256x128xbf16, #tpu.memory_space<vmem>>, vector<256x128xbf16>
    %cst_14 = arith.constant dense<0.000000e+00> : vector<256x128xf32>
    %18 = tpu.matmul %16, %17, %cst_14 {dimension_numbers = #tpu.dot_dimension_numbers<[1], [0], [0], [1], [0, 0, 1, 1], [], []>} : vector<256x256xbf16>, vector<256x128xbf16>, vector<256x128xf32> -> vector<256x128xf32>
    %c0_15 = arith.constant 0 : index
    %c0_16 = arith.constant 0 : index
    %19 = vector.load %arg7[%c0_15, %c0_16] : memref<1x128xf32, #tpu.memory_space<vmem>>, vector<1x128xf32>
    %20 = vector.broadcast %19 : vector<1x128xf32> to vector<256x128xf32>
    %21 = arith.addf %18, %20 : vector<256x128xf32>
    %c0_17 = arith.constant 0 : index
    %c0_18 = arith.constant 0 : index
    %22 = vector.load %arg8[%c0_17, %c0_18] : memref<256x128xf32, #tpu.memory_space<vmem>>, vector<256x128xf32>
    tpu.vector_store %arg8[%c0_17, %c0_18], %21 {strides = array<i32>} : memref<256x128xf32, #tpu.memory_space<vmem>>, vector<256x128xf32>,
    return
  }
  func.func @transform_0(%arg0: i32) -> (i32, i32) {
    %c0_i32 = arith.constant 0 : i32
    %c0_i32_0 = arith.constant 0 : i32
    return %arg0, %c0_i32 : i32, i32
  }
  func.func @transform_1(%arg0: i32) -> (i32, i32) {
    %c0_i32 = arith.constant 0 : i32
    %c0_i32_0 = arith.constant 0 : i32
    %c0_i32_1 = arith.constant 0 : i32
    return %c0_i32, %c0_i32_0 : i32, i32
  }
  func.func @transform_2(%arg0: i32) -> (i32, i32) {
    %c0_i32 = arith.constant 0 : i32
    %c0_i32_0 = arith.constant 0 : i32
    %c0_i32_1 = arith.constant 0 : i32
    return %c0_i32, %c0_i32_0 : i32, i32
  }
  func.func @transform_3(%arg0: i32) -> (i32, i32) {
    %c0_i32 = arith.constant 0 : i32
    %c0_i32_0 = arith.constant 0 : i32
    %c0_i32_1 = arith.constant 0 : i32
    return %c0_i32, %c0_i32_0 : i32, i32
  }
  func.func @transform_4(%arg0: i32) -> (i32, i32) {
    %c0_i32 = arith.constant 0 : i32
    %c0_i32_0 = arith.constant 0 : i32
    %c0_i32_1 = arith.constant 0 : i32
    return %c0_i32, %c0_i32_0 : i32, i32
  }
  func.func @transform_5(%arg0: i32) -> (i32, i32) {
    %c0_i32 = arith.constant 0 : i32
    %c0_i32_0 = arith.constant 0 : i32
    %c0_i32_1 = arith.constant 0 : i32
    return %c0_i32, %c0_i32_0 : i32, i32
  }
  func.func @transform_6(%arg0: i32) -> (i32, i32) {
    %c0_i32 = arith.constant 0 : i32
    %c0_i32_0 = arith.constant 0 : i32
    %c0_i32_1 = arith.constant 0 : i32
    return %c0_i32, %c0_i32_0 : i32, i32
  }
  func.func @transform_7(%arg0: i32) -> (i32, i32) {
    %c0_i32 = arith.constant 0 : i32
    %c0_i32_0 = arith.constant 0 : i32
    return %arg0, %c0_i32 : i32, i32
  }
}

</mosaic_0001>

<bundles_post_ra>
// kernel: tpu_custom_call.1
= control target key start
LH: loop header
LB: loop body
LE: loop exit
PB: predicated region body
PF: predicated region fallthrough
CT: control target
= control target key end

     0   :  { %s2982_s0 = inlined_call_operand.hbm [shape: bf16[1024,128], index: 0, kind: input, shape index: {}]   ;;  %s2983_s1 = inlined_call_operand.hbm [shape: bf16[128,256], index: 1, kind: input, shape index: {}]   ;;  %s2984_s2 = inlined_call_operand.vmem [shape: f32[1,256], index: 2, kind: input, shape index: {}]   ;;  %s2985_s3 = inlined_call_operand.hbm [shape: bf16[256,256], index: 3, kind: input, shape index: {}]   ;;  %s2986_s4 = inlined_call_operand.vmem [shape: f32[1,256], index: 4, kind: input, shape index: {}]   ;;  %s2987_s5 = inlined_call_operand.hbm [shape: bf16[256,128], index: 5, kind: input, shape index: {}]   ;;  %s2988_s6 = inlined_call_operand.vmem [shape: f32[1,128], index: 6, kind: input, shape index: {}]   ;;  %s2989_s7 = inlined_call_operand.hbm [shape: f32[1024,128], index: 7, kind: output, shape index: {}]  }
   0x1   :  { %2996 = sst [smem:[#allocation15_spill]] %s2983_s1 }
   0x2   :  { %12 = vsyncpa [#allocation3], 0 }
   0x3   :  { %14 = vsyncpa [#allocation3 + $0x1], 0 }
   0x4   :  { %15 = vsyncpa [#allocation6], 0 }
   0x5   :  { %16 = vsyncpa [#allocation9], 0 }
   0x6   :  { %17 = vsyncpa [#allocation4], 0 }
   0x7   :  { %19 = vsyncpa [#allocation4 + $0x1], 0  ;;  %s2457_s24 = smov 0   ;;  %s2459_s25 = smov 0  }
   0x8   :  { %s2461_s26 = smov 0   ;;  %s2463_s27 = smov 0  }
   0x9 LB: > { %s2478_s28 = sadd.s32 4294967295, %s2403_s27   ;;  %s1806_s29 = sadd.s32 4294967294, %s2403_s27   ;;  %s2403_s27 = sphi %s2463_s27, %s3018_s27   ;;  %s2399_s26 = sphi %s2461_s26, %s3017_s26   ;;  %s2395_s25 = sphi %s2459_s25, %s3016_s25   ;;  %s2391_s24 = sphi %s2457_s24, %s3015_s24  }
   0xa   : > { %p45_p0 = scmp.ne.s32.totalorder %s2395_s25, %s2391_s24  ;;  %p2990_p1 = scmp.eq.s32.totalorder %s2478_s28, 0 }
   0xb   : > { %p201_p3 = scmp.eq.s32.totalorder %s1806_s29, 3  ;;  %p1807_p5 = scmp.ge.s32.totalorder %s2403_s27, 1 }
   0xc   : > { %p2487_p4 = por %p2990_p1, %p45_p0  ;;  %p208_p7 = scmp.lt.s32.totalorder %s2403_s27, 5 }
   0xd   : > { %p2492_p6 = por %p201_p3, %p45_p0  ;;  %s2405_s10 = smov [#allocation5]  }
   0xe   : > { %s2997_s30 = scalar_select %p2487_p4, 1, 0 }
   0xf   : > { %s2998_s8 = scalar_select %p2492_p6, 1, 0 }
  0x10   : > { %p2497_p8 = pnand %p1807_p5, %p208_p7  ;;  %s220_s11 = sshll.u32 %s2405_s10, 4  ;;  %s221_s11 = int_to_ptr.vmem [resolvable:$true] %s220_s11 }
  0x11   : > { %s2406_s13 = smov [#allocation7]   ;;  %s2407_s15 = smov [#allocation8]  }
  0x12   : > { %s2999_s9 = scalar_select %p2497_p8, 1, 0 }
  0x13   : > { %p2053_p9 = pneg %p2497_p8  ;;  %s236_s14 = sshll.u32 %s2406_s13, 4  ;;  %s237_s14 = int_to_ptr.vmem [resolvable:$true] %s236_s14 }
  0x14   : > { %s252_s16 = sshll.u32 %s2407_s15, 4  ;;  %s2236_s17 = scalar_lea.vmem %s221_s11, 2048  ;;  %s253_s16 = int_to_ptr.vmem [resolvable:$true] %s252_s16 }
  0x15   : > { %p2505_p10 = pnand %p2053_p9, %p2990_p1  ;;  %p2237_p12 = scmp.ne.s32.totalorder %s221_s11, %s2236_s17 }
  0x16   : > { %p2244_p3 = scmp.lt.s32.totalorder %s221_s11, %s221_s11  ;;  %p2245_p5 = scmp.lt.s32.totalorder %s2236_s17, %s2236_s17 }
  0x17   : > { %p2227_p11 = pneg %p2505_p10 }
  0x18   : > { %p2246_p7 = por %p2245_p5, %p2244_p3 }
  0x19   : > { %p2239_p13 = pnand %p2237_p12, %p2227_p11 }
  0x1b   : > { %p2240_p0 = pneg %p2239_p13 }
  0x1d   : > { %p2247_p9 = pnand %p2246_p7, %p2240_p0 }
  0x1f   : > { %2250 = shalt.err (!%p2247_p9)
}
  0x20   : > { %s2408_s18 = smov 128   ;;  %s2409_s19 = smov 8  }
  0x21   : > { %s3001_s1 = sld [smem:[#allocation15_spill]]  ;;  %s2262_s22 = scalar_lea.vmem %s237_s14, 4096 }
  0x22   : > { %p2263_p1 = scmp.ne.s32.totalorder %s237_s14, %s2262_s22  ;;  %p2270_p2 = scmp.lt.s32.totalorder %s237_s14, %s237_s14 }
  0x23   : > { %p2271_p6 = scmp.lt.s32.totalorder %s2262_s22, %s2262_s22 }
  0x24   : > { %p2265_p12 = pnand %p2263_p1, %p2227_p11 }
  0x25   : > { %p2272_p3 = por %p2271_p6, %p2270_p2 }
  0x26   : > { %p2266_p13 = pneg %p2265_p12 }
  0x27   : > { %2056 = dma.hbm_to_vmem [thread:$0]  (!%p2505_p10), %s3001_s1, 2048, %s221_s11, [#allocation6], %s2408_s18, %s2408_s18, %s2409_s19  }
  0x28   : > { %p2273_p0 = pnand %p2272_p3, %p2266_p13 }
  0x2a   : > { %2276 = shalt.err (!%p2273_p0)
}
  0x2b   : > { %2059 = dma.hbm_to_vmem [thread:$0]  (!%p2505_p10), %s2985_s3, 4096, %s237_s14, [#allocation6], %s2408_s18, %s2408_s18, %s2409_s19  }
  0x2c   : > { %s2288_s10 = scalar_lea.vmem %s253_s16, 2048  ;;  %p2296_p9 = scmp.lt.s32.totalorder %s253_s16, %s253_s16 }
  0x2d   : > { %p2289_p5 = scmp.ne.s32.totalorder %s253_s16, %s2288_s10  ;;  %p2297_p12 = scmp.lt.s32.totalorder %s2288_s10, %s2288_s10 }
  0x2f   : > { %p2291_p7 = pnand %p2289_p5, %p2227_p11  ;;  %p2298_p4 = por %p2297_p12, %p2296_p9 }
  0x31   : > { %p2292_p1 = pneg %p2291_p7 }
  0x33   : > { %p2299_p2 = pnand %p2298_p4, %p2292_p1 }
  0x35   : > { %2302 = shalt.err (!%p2299_p2)
}
  0x36   : > { %s2992_s11 = smov 64   ;;  %s2993_s13 = smov 4  }
  0x37   : > { %2062 = dma.hbm_to_vmem [thread:$0]  (!%p2505_p10), %s2987_s5, 2048, %s253_s16, [#allocation9], %s2992_s11, %s2992_s11, %s2993_s13  }
  0x38   : > { %s2539_s17 = sadd.s32 1, %s2403_s27   ;;  %s32_s19 = sadd.s32 1, %s2399_s26 }
  0x39   : > { %s29_s18 = ssub.s32 %s2403_s27, %s2539_s17  ;;  %p39_p6 = scmp.ne.s32.totalorder %s2399_s26, %s2395_s25 }
  0x3a   : > { %p30_p4 = scmp.eq.s32.totalorder %s29_s18, 0  ;;  %p40_p11 = scmp.eq.s32.totalorder %s2403_s27, 0 }
  0x3b   : > { %p2074_p13 = scmp.lt.s32.totalorder %s2403_s27, 4  ;;  %p3002_p0 = scmp.eq.s32.totalorder %s2478_s28, 3 }
  0x3c   : > { %s2549_s20 = scalar_select %p30_p4, %s2399_s26, %s32_s19  }
  0x3d   : > { %p41_p3 = por %p40_p11, %p39_p6  ;;  %p2553_p5 = por %p3002_p0, %p39_p6 }
  0x3e   : > { %s269_s21 = sand.u32 1, %s2399_s26   ;;  %s1907_s22 = sshll.u32 %s2403_s27, 11 }
  0x3f   : > { %s3003_s12 = scalar_select %p2553_p5, 1, 0 }
  0x40   : > { %s1812_s16 = sshll.u32 %s269_s21, 7  ;;  %s2562_s10 = scalar_lea.hbm %s2982_s0, %s1907_s22 }
  0x41   : > { %s273_s14 = scalar_lea.vmem [#allocation2], %s1812_s16  ;;  %p2564_p10 = pnand %p2074_p13, %p41_p3 }
  0x42   : > { %s280_s15 = sshll.u32 %s273_s14, 4  ;;  %s2570_s19 = scalar_lea.sflag [#allocation3], %s269_s21  ;;  %s2568_s15 = int_to_ptr.vmem [resolvable:$true] %s280_s15 }
  0x43   : > { %s2303_s11 = scalar_lea.hbm %s2562_s10, 2048  ;;  %p2305_p1 = pneg %p2564_p10 }
  0x44   : > { %p2304_p7 = scmp.ne.s32.totalorder %s2562_s10, %s2303_s11  ;;  %s2308_s16 = scalar_lea.hbm %s2982_s0, 8192 }
  0x45   : > { %p2309_p2 = scmp.lt.s32.totalorder %s2562_s10, %s2982_s0  ;;  %p2310_p4 = scmp.lt.s32.totalorder %s2308_s16, %s2303_s11 }
  0x46   : > { %p2306_p9 = pnand %p2305_p1, %p2304_p7 }
  0x47   : > { %p2311_p6 = por %p2310_p4, %p2309_p2 }
  0x48   : > { %p2307_p12 = pneg %p2306_p9 }
  0x4a   : > { %p2312_p11 = pnand %p2311_p6, %p2307_p12 }
  0x4c   : > { %2315 = shalt.err (!%p2312_p11)
}
  0x4d   : > { %s2316_s21 = scalar_lea.vmem %s2568_s15, 2048  ;;  %s2412_s13 = smov [#allocation2]  }
  0x4e   : > { %p2317_p13 = scmp.ne.s32.totalorder %s2568_s15, %s2316_s21  ;;  %s2321_s1 = sshll.u32 %s2412_s13, 4  ;;  %s2322_s1 = int_to_ptr.vmem [resolvable:$false] %s2321_s1 }
  0x4f   : > { %s2323_s22 = scalar_lea.vmem %s2322_s1, 4096  ;;  %p2324_p7 = scmp.lt.s32.totalorder %s2568_s15, %s2322_s1 }
  0x50   : > { %p2319_p3 = pnand %p2317_p13, %p2305_p1  ;;  %p2325_p9 = scmp.lt.s32.totalorder %s2323_s22, %s2316_s21 }
  0x52   : > { %p2320_p0 = pneg %p2319_p3  ;;  %p2326_p5 = por %p2325_p9, %p2324_p7 }
  0x54   : > { %p2327_p8 = pnand %p2326_p5, %p2320_p0 }
  0x56   : > { %2330 = shalt.err (!%p2327_p8)
}
  0x57   : > { %s3005_s11 = smov 4   ;;  %s3006_s23 = smov 64  }
  0x58   : > { %2066 = dma.hbm_to_vmem [thread:$0]  (!%p2564_p10), %s2562_s10, 2048, %s2568_s15, %s2570_s19, %s3006_s23, %s3006_s23, %s3005_s11  }
  0x59   : > { %p3007_p1 = scmp.ne.s32.totalorder %s2999_s9, 0 }
  0x5a   : > { %s2597_s13 = sand.u32 (!%p3007_p1), 1, %s2395_s25   ;;  %p3008_p8 = scmp.ne.s32.totalorder (!%p3007_p1), %s2997_s30, 0 }
  0x5b   : > { %292 = sbr.rel (%p3007_p1) target bundleno = 886 (0x376), region = 48  ;;  %s1816_s1 = sshll.u32 (!%p3007_p1), %s2597_s13, 7 }
  0x5c   : > { %s295_s16 = scalar_lea.sflag (!%p3007_p1), [#allocation3], %s2597_s13  ;;  %s2601_s29 = scalar_lea.vmem (!%p3007_p1), [#allocation2], %s1816_s1 }
  0x60   : > { %2374 = dma.done.wait (%p3008_p8), %s295_s16, 2048  }
  0x61   : > { %2376 = vsyncadd (%p3008_p8), %s295_s16, 4294965248  ;;  %p3009_p5 = scmp.eq.s32.totalorder %s2478_s28, 0 }
  0x63   : > { %2378 = dma.done.wait (%p3009_p5), [#allocation6], 6144   ;;  %p3010_p10 = pmov %p3009_p5 }
  0x64   : > { %p3011_p12 = pmov %p3009_p5 }
  0x65   : > { %2380 = vsyncadd (%p3010_p10), [#allocation6], 4294961152 }
  0x66   : > { %2382 = dma.done.wait (%p3011_p12), [#allocation9], 2048   ;;  %p3012_p2 = pmov %p3009_p5 }
  0x67   : > { %v2413_v0 = vmov 0   ;;  %v2121_v1 = vld [vmem:[#allocation5 + $0x74] ss:$8 sps:$4 sm:$0xff]   ;;  %v2123_v2 = vld [vmem:[#allocation5 + $0x70] ss:$8 sps:$4 sm:$0xff]   ;;  %v2145_v18 = vld [vmem:[%s2601_s29] sm:$0xff]  }
  0x68   : > { %2384 = vsyncadd (%p3012_p2), [#allocation9], 4294965248  ;;  %612 = vmatprep.mubr.bf16.mxu0 %v2413_v0  ;;  %692 = vmatprep.mubr.bf16.mxu1 %v2413_v0  ;;  %v2124_v3 = vld [vmem:[#allocation5 + $0x64] ss:$8 sps:$4 sm:$0xff]   ;;  %v2126_v4 = vld [vmem:[#allocation5 + $0x60] ss:$8 sps:$4 sm:$0xff]  }
  0x69   : > { %580 = vmatprep.subr.bf16.mxu0 %v2121_v1  ;;  %2021 = vmatprep.subr.bf16.mxu1 %v2121_v1  ;;  %v2127_v5 = vld [vmem:[#allocation5 + $0x54] ss:$8 sps:$4 sm:$0xff]   ;;  %v2129_v6 = vld [vmem:[#allocation5 + $0x50] ss:$8 sps:$4 sm:$0xff]   ;;  %v2130_v7 = vld [vmem:[#allocation5 + $0x44] ss:$8 sps:$4 sm:$0xff]  }
  0x6a   : > { %581 = vmatpush1.bf16.msra.mxu0 %v2123_v2  ;;  %2029 = vmatpush1.bf16.msra.mxu1 %v2123_v2  ;;  %v2132_v8 = vld [vmem:[#allocation5 + $0x40] ss:$8 sps:$4 sm:$0xff]   ;;  %v2133_v9 = vld [vmem:[#allocation5 + $0x34] ss:$8 sps:$4 sm:$0xff]   ;;  %v2135_v10 = vld [vmem:[#allocation5 + $0x30] ss:$8 sps:$4 sm:$0xff]   ;;  %v394_v2 = vlaneseq }
  0x6b   : > { %582 = vmatprep.subr.bf16.mxu0 %v2124_v3  ;;  %2022 = vmatprep.subr.bf16.mxu1 %v2124_v3  ;;  %v2136_v11 = vld [vmem:[#allocation5 + $0x24] ss:$8 sps:$4 sm:$0xff]   ;;  %v2138_v12 = vld [vmem:[#allocation5 + $0x20] ss:$8 sps:$4 sm:$0xff]   ;;  %v2139_v13 = vld [vmem:[#allocation5 + $0x14] ss:$8 sps:$4 sm:$0xff]  }
  0x6c   : > { %v2141_v14 = vld [vmem:[#allocation5 + $0x10] ss:$8 sps:$4 sm:$0xff]   ;;  %v2142_v15 = vld [vmem:[#allocation5 + $0x4] ss:$8 sps:$4 sm:$0xff]   ;;  %v2144_v16 = vld [vmem:[#allocation5] ss:$8 sps:$4 sm:$0xff]  }
  0x6d   : > { %v2163_v17 = vld [vmem:[#allocation7 + $0x74] ss:$8 sps:$4 sm:$0xff]   ;;  %v2153_v19 = vld [vmem:[%s2601_s29 + $0x40] sm:$0xff]   ;;  %v2161_v20 = vld [vmem:[#allocation7 + $0x70] ss:$8 sps:$4 sm:$0xff]   ;;  %v2647_v3 = vshrl.u32 %v394_v2, 7 }
  0x6e   : > { %583 = vmatpush1.bf16.msra.mxu0 %v2126_v4  ;;  %2030 = vmatpush1.bf16.msra.mxu1 %v2126_v4  ;;  %v2166_v21 = vld [vmem:[#allocation7 + $0x64] ss:$8 sps:$4 sm:$0xff]   ;;  %v2164_v22 = vld [vmem:[#allocation7 + $0x60] ss:$8 sps:$4 sm:$0xff]   ;;  %v2169_v23 = vld [vmem:[#allocation7 + $0x54] ss:$8 sps:$4 sm:$0xff]  }
  0x6f   : > { %584 = vmatprep.subr.bf16.mxu0 %v2127_v5  ;;  %2023 = vmatprep.subr.bf16.mxu1 %v2127_v5  ;;  %v2146_v24 = vld [vmem:[%s2601_s29 + $0x8] sm:$0xff]   ;;  %v2167_v26 = vld [vmem:[#allocation7 + $0x50] ss:$8 sps:$4 sm:$0xff]   ;;  %v2175_v31 = vld [vmem:[#allocation7 + $0x34] ss:$8 sps:$4 sm:$0xff]   ;;  %v396_v4 = vsub.s32 0, %v2647_v3 }
  0x70   : > { %v2154_v25 = vld [vmem:[%s2601_s29 + $0x48] sm:$0xff]   ;;  %v2147_v29 = vld [vmem:[%s2601_s29 + $0x10] sm:$0xff]   ;;  %v2148_v36 = vld [vmem:[%s2601_s29 + $0x18] sm:$0xff]   ;;  %s1820_s18 = sshll.u32 %s2597_s13, 8  ;;  %s1908_s22 = sshll.u32 %s2478_s28, 12 }
  0x71   : > { %v2172_v27 = vld [vmem:[#allocation7 + $0x44] ss:$8 sps:$4 sm:$0xff]   ;;  %v2170_v28 = vld [vmem:[#allocation7 + $0x40] ss:$8 sps:$4 sm:$0xff]   ;;  %v2155_v30 = vld [vmem:[%s2601_s29 + $0x50] sm:$0xff]   ;;  %s2868_s21 = scalar_lea.vmem [#allocation10], %s1820_s18  ;;  %s2936_s16 = scalar_lea.hbm %s2989_s7, %s1908_s22 }
  0x72   : > { %585 = vmatpush1.bf16.msra.mxu0 %v2129_v6  ;;  %2031 = vmatpush1.bf16.msra.mxu1 %v2129_v6  ;;  %v2173_v32 = vld [vmem:[#allocation7 + $0x30] ss:$8 sps:$4 sm:$0xff]   ;;  %v2178_v33 = vld [vmem:[#allocation7 + $0x24] ss:$8 sps:$4 sm:$0xff]   ;;  %v2176_v34 = vld [vmem:[#allocation7 + $0x20] ss:$8 sps:$4 sm:$0xff]  }
  0x73   : > { %586 = vmatprep.subr.bf16.mxu0 %v2130_v7  ;;  %2024 = vmatprep.subr.bf16.mxu1 %v2130_v7  ;;  %v2181_v35 = vld [vmem:[#allocation7 + $0x14] ss:$8 sps:$4 sm:$0xff]   ;;  %v2179_v38 = vld [vmem:[#allocation7 + $0x10] ss:$8 sps:$4 sm:$0xff]   ;;  %v2184_v39 = vld [vmem:[#allocation7 + $0x4] ss:$8 sps:$4 sm:$0xff]  }
  0x74   : > { %v2156_v37 = vld [vmem:[%s2601_s29 + $0x58] sm:$0xff]   ;;  %v2182_v40 = vld [vmem:[#allocation7] ss:$8 sps:$4 sm:$0xff]   ;;  %v2190_v45 = vld [vmem:[#allocation7 + $0xe4] ss:$8 sps:$4 sm:$0xff]   ;;  %s1704_s11 = sshll.u32 %s2868_s21, 4  ;;  %s2938_s11 = int_to_ptr.vmem [resolvable:$true] %s1704_s11 }
  0x75   : > { %v2187_v41 = vld [vmem:[#allocation7 + $0xf4] ss:$8 sps:$4 sm:$0xff]   ;;  %v2149_v42 = vld [vmem:[%s2601_s29 + $0x20] sm:$0xff]   ;;  %v2185_v44 = vld [vmem:[#allocation7 + $0xf0] ss:$8 sps:$4 sm:$0xff]   ;;  %s2331_s30 = scalar_lea.vmem %s2938_s11, 4096 }
  0x76   : > { %587 = vmatpush1.bf16.msra.mxu0 %v2132_v8  ;;  %2032 = vmatpush1.bf16.msra.mxu1 %v2132_v8  ;;  %v2157_v43 = vld [vmem:[%s2601_s29 + $0x60] sm:$0xff]   ;;  %v2193_v47 = vld [vmem:[#allocation7 + $0xd4] ss:$8 sps:$4 sm:$0xff]   ;;  %v2150_v48 = vld [vmem:[%s2601_s29 + $0x28] sm:$0xff]   ;;  %p2332_p4 = scmp.ne.s32.totalorder %s2938_s11, %s2331_s30  ;;  %p3013_p6 = scmp.ne.s32.totalorder %s3003_s12, 0 }
  0x77   : > { %588 = vmatprep.subr.bf16.mxu0 %v2133_v9  ;;  %2025 = vmatprep.subr.bf16.mxu1 %v2133_v9  ;;  %v2188_v46 = vld [vmem:[#allocation7 + $0xe0] ss:$8 sps:$4 sm:$0xff]   ;;  %v2191_v50 = vld [vmem:[#allocation7 + $0xd0] ss:$8 sps:$4 sm:$0xff]   ;;  %v2196_v51 = vld [vmem:[#allocation7 + $0xc4] ss:$8 sps:$4 sm:$0xff]  }
  0x78   : > { %v2158_v49 = vld [vmem:[%s2601_s29 + $0x68] sm:$0xff]   ;;  %v2199_v53 = vld [vmem:[#allocation7 + $0xb4] ss:$8 sps:$4 sm:$0xff]   ;;  %v2197_v56 = vld [vmem:[#allocation7 + $0xb0] ss:$8 sps:$4 sm:$0xff]   ;;  %p2333_p11 = pnand %p2332_p4, %p3013_p6  ;;  %s2414_s28 = smov [#allocation10]  }
  0x79   : > { %v2194_v52 = vld [vmem:[#allocation7 + $0xc0] ss:$8 sps:$4 sm:$0xff]   ;;  %v2151_v54 = vld [vmem:[%s2601_s29 + $0x30] sm:$0xff]   ;;  %v2152_v57 = vld [vmem:[%s2601_s29 + $0x38] sm:$0xff]   ;;  %s2335_s9 = sshll.u32 %s2414_s28, 4  ;;  %s2336_s9 = int_to_ptr.vmem [resolvable:$false] %s2335_s9 }
  0x7a   : > { %589 = vmatpush1.bf16.msra.mxu0 %v2135_v10  ;;  %2033 = vmatpush1.bf16.msra.mxu1 %v2135_v10  ;;  %v2159_v55 = vld [vmem:[%s2601_s29 + $0x70] sm:$0xff]   ;;  %v2160_v58 = vld [vmem:[%s2601_s29 + $0x78] sm:$0xff]   ;;  %v2202_v59 = vld [vmem:[#allocation7 + $0xa4] ss:$8 sps:$4 sm:$0xff]   ;;  %s1691_s29 = scalar_lea.sflag [#allocation4], %s2597_s13  ;;  %p2334_p13 = pneg %p2333_p11 }
  0x7b   : > { %590 = vmatprep.subr.bf16.mxu0 %v2136_v11  ;;  %2026 = vmatprep.subr.bf16.mxu1 %v2136_v11  ;;  %v2200_v60 = vld [vmem:[#allocation7 + $0xa0] ss:$8 sps:$4 sm:$0xff]   ;;  %v2205_v61 = vld [vmem:[#allocation7 + $0x94] ss:$8 sps:$4 sm:$0xff]   ;;  %v2203_v62 = vld [vmem:[#allocation7 + $0x90] ss:$8 sps:$4 sm:$0xff]   ;;  %p2338_p3 = scmp.lt.s32.totalorder %s2938_s11, %s2336_s9 }
  0x7c   : > { %v2208_v63 = vld [vmem:[#allocation7 + $0x84] ss:$8 sps:$4 sm:$0xff]   ;;  %v2206_v1 = vld [vmem:[#allocation7 + $0x80] ss:$8 sps:$4 sm:$0xff]   ;;  %s2337_s10 = scalar_lea.vmem %s2336_s9, 8192 }
  0x7d   : > { %v392_v5 = vld [vmem:[%s2984_s2] sm:$0x3]  ;;  %p2339_p0 = scmp.lt.s32.totalorder %s2337_s10, %s2331_s30 }
  0x7e   : > { %591 = vmatpush1.bf16.msra.mxu0 %v2138_v12  ;;  %2034 = vmatpush1.bf16.msra.mxu1 %v2138_v12  ;;  %v2662_v9 = vrot.slane %v392_v5, %v396_v4 }
  0x7f   : > { %592 = vmatprep.subr.bf16.mxu0 %v2139_v13  ;;  %2027 = vmatprep.subr.bf16.mxu1 %v2139_v13  ;;  %p2340_p7 = por %p2339_p0, %p2338_p3 }
  0x81   : > { %p2341_p9 = pnand %p2340_p7, %p2334_p13 }
  0x82   : > { %593 = vmatpush1.bf16.msra.mxu0 %v2141_v14  ;;  %2035 = vmatpush1.bf16.msra.mxu1 %v2141_v14 }
  0x83   : > { %594 = vmatprep.subr.bf16.mxu0 %v2142_v15  ;;  %2028 = vmatprep.subr.bf16.mxu1 %v2142_v15 }
  0x86   : > { %595 = vmatpush1.bf16.msra.mxu0 %v2144_v16  ;;  %2036 = vmatpush1.bf16.msra.mxu1 %v2144_v16 }
  0x87   : > { %1073 = vmatprep.subr.bf16.mxu1 %v2163_v17 }
  0x89   : > { %613 = vmatmul.mubr.bf16.vlgmr.msra.gmra.mxu0 %v2145_v18  ;;  %693 = vmatmul.mubr.bf16.vlgmr.msra.gmra.mxu1 %v2153_v19  ;;  %v2209_v19 = vld [vmem:[#allocation8 + $0x78] sm:$0xff]  }
  0x8a   : > { %622 = vmatprep.mubr.bf16.mxu0 %v2413_v0  ;;  %702 = vmatprep.mubr.bf16.mxu1 %v2413_v0 }
  0x8b   : > { %1074 = vmatpush1.bf16.msra.mxu1 %v2161_v20  ;;  %v2210_v20 = vld [vmem:[#allocation8 + $0x38] sm:$0xff]   ;;  %1909 = vmatprep.subr.bf16.mxu0 %v2209_v19 }
  0x8c   : > { %1075 = vmatprep.subr.bf16.mxu1 %v2166_v21  ;;  %v2211_v21 = vld [vmem:[#allocation8 + $0x70] sm:$0xff]   ;;  %1910 = vmatpush3.bf16.msra.mxu0 %v2210_v20 }
  0x8d   : > { %1911 = vmatprep.subr.bf16.mxu0 %v2211_v21 }
  0x8f   : > { %1076 = vmatpush1.bf16.msra.mxu1 %v2164_v22 }
  0x90   : > { %1077 = vmatprep.subr.bf16.mxu1 %v2169_v23 }
  0x91   : > { %623 = vmatmul.mubr.bf16.gmra.mxu0 %v2146_v24  ;;  %703 = vmatmul.mubr.bf16.gmra.mxu1 %v2154_v25 }
  0x92   : > { %632 = vmatprep.mubr.bf16.mxu0 %v2413_v0  ;;  %712 = vmatprep.mubr.bf16.mxu1 %v2413_v0 }
  0x93   : > { %1078 = vmatpush1.bf16.msra.mxu1 %v2167_v26 }
  0x94   : > { %1079 = vmatprep.subr.bf16.mxu1 %v2172_v27 }
  0x97   : > { %1080 = vmatpush1.bf16.msra.mxu1 %v2170_v28  ;;  %v2212_v28 = vld [vmem:[#allocation8 + $0x30] sm:$0xff]  }
  0x98   : > { %1081 = vmatprep.subr.bf16.mxu1 %v2175_v31  ;;  %1912 = vmatpush3.bf16.msra.mxu0 %v2212_v28 }
  0x99   : > { %633 = vmatmul.mubr.bf16.gmra.mxu0 %v2147_v29  ;;  %713 = vmatmul.mubr.bf16.gmra.mxu1 %v2155_v30 }
  0x9a   : > { %642 = vmatprep.mubr.bf16.mxu0 %v2413_v0  ;;  %722 = vmatprep.mubr.bf16.mxu1 %v2413_v0 }
  0x9b   : > { %1082 = vmatpush1.bf16.msra.mxu1 %v2173_v32  ;;  %v2213_v32 = vld [vmem:[#allocation8 + $0x68] sm:$0xff]  }
  0x9c   : > { %1083 = vmatprep.subr.bf16.mxu1 %v2178_v33  ;;  %1913 = vmatprep.subr.bf16.mxu0 %v2213_v32 }
  0x9f   : > { %1084 = vmatpush1.bf16.msra.mxu1 %v2176_v34 }
  0xa0   : > { %1085 = vmatprep.subr.bf16.mxu1 %v2181_v35 }
  0xa1   : > { %643 = vmatmul.mubr.bf16.gmra.mxu0 %v2148_v36  ;;  %723 = vmatmul.mubr.bf16.gmra.mxu1 %v2156_v37 }
  0xa2   : > { %652 = vmatprep.mubr.bf16.mxu0 %v2413_v0  ;;  %732 = vmatprep.mubr.bf16.mxu1 %v2413_v0 }
  0xa3   : > { %1086 = vmatpush1.bf16.msra.mxu1 %v2179_v38 }
  0xa4   : > { %1087 = vmatprep.subr.bf16.mxu1 %v2184_v39  ;;  %v2214_v39 = vld [vmem:[#allocation8 + $0x28] sm:$0xff]  }
  0xa5   : > { %1914 = vmatpush3.bf16.msra.mxu0 %v2214_v39 }
  0xa7   : > { %1088 = vmatpush1.bf16.msra.mxu1 %v2182_v40 }
  0xa8   : > { %1089 = vmatprep.subr.bf16.mxu1 %v2187_v41 }
  0xa9   : > { %653 = vmatmul.mubr.bf16.gmra.mxu0 %v2149_v42  ;;  %733 = vmatmul.mubr.bf16.gmra.mxu1 %v2157_v43  ;;  %v2215_v42 = vld [vmem:[#allocation8 + $0x60] sm:$0xff]  }
  0xaa   : > { %662 = vmatprep.mubr.bf16.mxu0 %v2413_v0  ;;  %742 = vmatprep.mubr.bf16.mxu1 %v2413_v0 }
  0xab   : > { %1090 = vmatpush2.bf16.msra.mxu1 %v2185_v44  ;;  %1915 = vmatprep.subr.bf16.mxu0 %v2215_v42 }
  0xac   : > { %1091 = vmatprep.subr.bf16.mxu1 %v2190_v45 }
  0xaf   : > { %1092 = vmatpush2.bf16.msra.mxu1 %v2188_v46 }
  0xb0   : > { %1093 = vmatprep.subr.bf16.mxu1 %v2193_v47 }
  0xb1   : > { %663 = vmatmul.mubr.bf16.gmra.mxu0 %v2150_v48  ;;  %743 = vmatmul.mubr.bf16.gmra.mxu1 %v2158_v49  ;;  %v2216_v49 = vld [vmem:[#allocation8 + $0x20] sm:$0xff]  }
  0xb2   : > { %672 = vmatprep.mubr.bf16.mxu0 %v2413_v0  ;;  %752 = vmatprep.mubr.bf16.mxu1 %v2413_v0 }
  0xb3   : > { %1094 = vmatpush2.bf16.msra.mxu1 %v2191_v50  ;;  %1916 = vmatpush3.bf16.msra.mxu0 %v2216_v49 }
  0xb4   : > { %1095 = vmatprep.subr.bf16.mxu1 %v2196_v51 }
  0xb7   : > { %1096 = vmatpush2.bf16.msra.mxu1 %v2194_v52  ;;  %v2217_v52 = vld [vmem:[#allocation8 + $0x58] sm:$0xff]  }
  0xb8   : > { %1097 = vmatprep.subr.bf16.mxu1 %v2199_v53  ;;  %1917 = vmatprep.subr.bf16.mxu0 %v2217_v52 }
  0xb9   : > { %673 = vmatmul.mubr.bf16.gmra.mxu0 %v2151_v54  ;;  %753 = vmatmul.mubr.bf16.gmra.mxu1 %v2159_v55 }
  0xba   : > { %682 = vmatprep.mubr.bf16.mxu0 %v2413_v0  ;;  %762 = vmatprep.mubr.bf16.mxu1 %v2413_v0  ;;  %v400_v0 = vsub.s32 1, %v2647_v3 }
  0xbb   : > { %1098 = vmatpush2.bf16.msra.mxu1 %v2197_v56 }
  0xbc   : > { %1099 = vmatprep.subr.bf16.mxu1 %v2202_v59  ;;  %v2658_v8 = vrot.slane %v392_v5, %v400_v0  ;;  %v2218_v59 = vld [vmem:[#allocation8 + $0x18] sm:$0xff]  }
  0xbd   : > { %1918 = vmatpush3.bf16.msra.mxu0 %v2218_v59 }
  0xbf   : > { %1100 = vmatpush2.bf16.msra.mxu1 %v2200_v60 }
  0xc0   : > { %1101 = vmatprep.subr.bf16.mxu1 %v2205_v61 }
  0xc1   : > { %683 = vmatmul.mubr.bf16.gmra.mxu0 %v2152_v57  ;;  %763 = vmatmul.mubr.bf16.gmra.mxu1 %v2160_v58 }
  0xc3   : > { %1102 = vmatpush2.bf16.msra.mxu1 %v2203_v62  ;;  %v2219_v62 = vld [vmem:[#allocation8 + $0x50] sm:$0xff]  }
  0xc4   : > { %1103 = vmatprep.subr.bf16.mxu1 %v2208_v63  ;;  %1919 = vmatprep.subr.bf16.mxu0 %v2219_v62 }
  0xc7   : > { %1104 = vmatpush2.bf16.msra.mxu1 %v2206_v1 }
 0x149   : > { %v614_v6 = vpop.f32.mrf.mxu0  ;;  %v2654_v7 = vpop.f32.mrf.mxu1 }
 0x14a   : > { %v615_v16 = vadd.f32 %v614_v6, %v2662_v9 }
 0x14b   : > { %v616_v10 = vpop.f32.mrf.mxu0  ;;  %v2664_v11 = vpop.f32.mrf.mxu1 }
 0x14c   : > { %v617_v14 = vadd.f32 %v616_v10, %v2658_v8  ;;  %v773_v29 = vmax.f32 %v615_v16, 0.0  ;;  %v2221_v16 = vld [vmem:[#allocation8 + $0x48] sm:$0xff]  }
 0x14d   : > { %v618_v12 = vpop.f32.mrf.mxu0  ;;  %v2666_v13 = vpop.f32.mrf.mxu1 }
 0x14e   : > { %v619_v15 = vadd.f32 %v618_v12, %v2662_v9  ;;  %v774_v26 = vmax.f32 %v617_v14, 0.0  ;;  %v2220_v12 = vld [vmem:[#allocation8 + $0x10] sm:$0xff]  }
 0x14f   : > { %v620_v17 = vpop.f32.mrf.mxu0  ;;  %v2671_v18 = vpop.f32.mrf.mxu1  ;;  %1920 = vmatpush3.bf16.msra.mxu0 %v2220_v12 }
 0x150   : > { %v621_v22 = vadd.f32 %v620_v17, %v2658_v8  ;;  %v775_v23 = vmax.f32 %v619_v15, 0.0  ;;  %1921 = vmatprep.subr.bf16.mxu0 %v2221_v16 }
 0x151   : > { %v624_v24 = vpop.f32.mrf.mxu0  ;;  %v2674_v25 = vpop.f32.mrf.mxu1 }
 0x152   : > { %v776_v27 = vmax.f32 %v621_v22, 0.0  ;;  %v837_v34 = vpack.c.bf16 %v775_v23, %v773_v29  ;;  %v625_v40 = vadd.f32 %v624_v24, %v2662_v9  ;;  %v2222_v24 = vld [vmem:[#allocation8 + $0x8] sm:$0xff]  }
 0x153   : > { %v626_v30 = vpop.f32.mrf.mxu0  ;;  %v2676_v31 = vpop.f32.mrf.mxu1  ;;  %1922 = vmatpush3.bf16.msra.mxu0 %v2222_v24 }
 0x154   : > { %v838_v33 = vpack.c.bf16 %v776_v27, %v774_v26  ;;  %v627_v37 = vadd.f32 %v626_v30, %v2658_v8  ;;  %v777_v50 = vmax.f32 %v625_v40, 0.0 }
 0x155   : > { %v628_v35 = vpop.f32.mrf.mxu0  ;;  %v2678_v36 = vpop.f32.mrf.mxu1 }
 0x156   : > { %v629_v38 = vadd.f32 %v628_v35, %v2662_v9  ;;  %1105 = vmatprep.mubr.bf16.mxu1 %v838_v33  ;;  %v778_v47 = vmax.f32 %v627_v37, 0.0 }
 0x157   : > { %v630_v41 = vpop.f32.mrf.mxu0  ;;  %1106 = vmatmul.mubr.bf16.vlgmr.msra.gmra.mxu1 %v837_v34  ;;  %v2684_v46 = vpop.f32.mrf.mxu1 }
 0x158   : > { %v631_v43 = vadd.f32 %v630_v41, %v2658_v8  ;;  %v779_v44 = vmax.f32 %v629_v38, 0.0 }
 0x159   : > { %v634_v45 = vpop.f32.mrf.mxu0  ;;  %v2686_v56 = vpop.f32.mrf.mxu1 }
 0x15a   : > { %v780_v48 = vmax.f32 %v631_v43, 0.0  ;;  %v839_v54 = vpack.c.bf16 %v779_v44, %v777_v50  ;;  %v635_v60 = vadd.f32 %v634_v45, %v2662_v9 }
 0x15b   : > { %v636_v51 = vpop.f32.mrf.mxu0  ;;  %v2692_v5 = vpop.f32.mrf.mxu1 }
 0x15c   : > { %v840_v53 = vpack.c.bf16 %v780_v48, %v778_v47  ;;  %v637_v57 = vadd.f32 %v636_v51, %v2658_v8  ;;  %v781_v14 = vmax.f32 %v635_v60, 0.0 }
 0x15d   : > { %v638_v55 = vpop.f32.mrf.mxu0  ;;  %v2694_v21 = vpop.f32.mrf.mxu1 }
 0x15e   : > { %v639_v58 = vadd.f32 %v638_v55, %v2662_v9  ;;  %1115 = vmatprep.mubr.bf16.mxu1 %v840_v53  ;;  %v782_v6 = vmax.f32 %v637_v57, 0.0 }
 0x15f   : > { %v640_v61 = vpop.f32.mrf.mxu0  ;;  %1116 = vmatmul.mubr.bf16.gmra.mxu1 %v839_v54  ;;  %v2700_v32 = vpop.f32.mrf.mxu1 }
 0x160   : > { %v641_v63 = vadd.f32 %v640_v61, %v2658_v8  ;;  %v783_v1 = vmax.f32 %v639_v58, 0.0 }
 0x161   : > { %v644_v2 = vpop.f32.mrf.mxu0  ;;  %v2702_v41 = vpop.f32.mrf.mxu1 }
 0x162   : > { %v784_v10 = vmax.f32 %v641_v63, 0.0  ;;  %v841_v19 = vpack.c.bf16 %v783_v1, %v781_v14  ;;  %v645_v26 = vadd.f32 %v644_v2, %v2662_v9 }
 0x163   : > { %v646_v15 = vpop.f32.mrf.mxu0  ;;  %v2708_v50 = vpop.f32.mrf.mxu1 }
 0x164   : > { %v842_v17 = vpack.c.bf16 %v784_v10, %v782_v6  ;;  %v647_v22 = vadd.f32 %v646_v15, %v2658_v8  ;;  %v785_v35 = vmax.f32 %v645_v26, 0.0 }
 0x165   : > { %v648_v20 = vpop.f32.mrf.mxu0  ;;  %v2710_v59 = vpop.f32.mrf.mxu1 }
 0x166   : > { %v649_v23 = vadd.f32 %v648_v20, %v2662_v9  ;;  %1125 = vmatprep.mubr.bf16.mxu1 %v842_v17  ;;  %v786_v33 = vmax.f32 %v647_v22, 0.0 }
 0x167   : > { %v650_v27 = vpop.f32.mrf.mxu0  ;;  %1126 = vmatmul.mubr.bf16.gmra.mxu1 %v841_v19  ;;  %v2716_v10 = vpop.f32.mrf.mxu1 }
 0x168   : > { %v651_v28 = vadd.f32 %v650_v27, %v2658_v8  ;;  %v787_v29 = vmax.f32 %v649_v23, 0.0 }
 0x169   : > { %v654_v30 = vpop.f32.mrf.mxu0  ;;  %v2718_v22 = vpop.f32.mrf.mxu1 }
 0x16a   : > { %v788_v34 = vmax.f32 %v651_v28, 0.0  ;;  %v843_v39 = vpack.c.bf16 %v787_v29, %v785_v35  ;;  %v655_v44 = vadd.f32 %v654_v30, %v2662_v9 }
 0x16b   : > { %v656_v37 = vpop.f32.mrf.mxu0 }
 0x16c   : > { %v844_v38 = vpack.c.bf16 %v788_v34, %v786_v33  ;;  %v657_v42 = vadd.f32 %v656_v37, %v2658_v8  ;;  %v789_v53 = vmax.f32 %v655_v44, 0.0  ;;  %v2724_v33 = vpop.f32.mrf.mxu1 }
 0x16d   : > { %v658_v40 = vpop.f32.mrf.mxu0 }
 0x16e   : > { %v659_v43 = vadd.f32 %v658_v40, %v2662_v9  ;;  %1135 = vmatprep.mubr.bf16.mxu1 %v844_v38  ;;  %v790_v51 = vmax.f32 %v657_v42, 0.0  ;;  %v697_v40 = vadd.f32 %v2664_v11, %v2658_v8  ;;  %v701_v42 = vadd.f32 %v2671_v18, %v2658_v8 }
 0x16f   : > { %v660_v45 = vpop.f32.mrf.mxu0  ;;  %1136 = vmatmul.mubr.bf16.gmra.mxu1 %v843_v39 }
 0x170   : > { %v661_v47 = vadd.f32 %v660_v45, %v2658_v8  ;;  %v791_v48 = vmax.f32 %v659_v43, 0.0  ;;  %v2730_v45 = vpop.f32.mrf.mxu1  ;;  %v808_v11 = vmax.f32 %v701_v42, 0.0  ;;  %v2224_v42 = vld [vmem:[#allocation8] sm:$0xff]  }
 0x171   : > { %v664_v49 = vpop.f32.mrf.mxu0 }
 0x172   : > { %v792_v52 = vmax.f32 %v661_v47, 0.0  ;;  %v845_v57 = vpack.c.bf16 %v791_v48, %v789_v53  ;;  %v665_v62 = vadd.f32 %v664_v49, %v2662_v9 }
 0x173   : > { %v666_v54 = vpop.f32.mrf.mxu0 }
 0x174   : > { %v846_v55 = vpack.c.bf16 %v792_v52, %v790_v51  ;;  %v667_v60 = vadd.f32 %v666_v54, %v2658_v8  ;;  %v793_v15 = vmax.f32 %v665_v62, 0.0  ;;  %v806_v52 = vmax.f32 %v697_v40, 0.0 }
 0x175   : > { %v668_v58 = vpop.f32.mrf.mxu0  ;;  %v707_v62 = vadd.f32 %v2676_v31, %v2658_v8 }
 0x176   : > { %v669_v61 = vadd.f32 %v668_v58, %v2662_v9  ;;  %1145 = vmatprep.mubr.bf16.mxu1 %v846_v55  ;;  %v794_v12 = vmax.f32 %v667_v60, 0.0  ;;  %v740_v55 = vpop.f32.mrf.mxu1 }
 0x177   : > { %v670_v63 = vpop.f32.mrf.mxu0  ;;  %1146 = vmatmul.mubr.bf16.gmra.mxu1 %v845_v57 }
 0x178   : > { %v671_v1 = vadd.f32 %v670_v63, %v2658_v8  ;;  %v795_v2 = vmax.f32 %v669_v61, 0.0  ;;  %v854_v61 = vpack.c.bf16 %v808_v11, %v806_v52  ;;  %v711_v63 = vadd.f32 %v2684_v46, %v2658_v8 }
 0x179   : > { %v674_v6 = vpop.f32.mrf.mxu0  ;;  %v717_v46 = vadd.f32 %v2692_v5, %v2658_v8  ;;  %v727_v5 = vadd.f32 %v2708_v50, %v2658_v8 }
 0x17a   : > { %v796_v14 = vmax.f32 %v671_v1, 0.0  ;;  %v847_v19 = vpack.c.bf16 %v795_v2, %v793_v15  ;;  %v675_v26 = vadd.f32 %v674_v6, %v2662_v9  ;;  %v695_v1 = vadd.f32 %v2654_v7, %v2662_v9 }
 0x17b   : > { %v676_v16 = vpop.f32.mrf.mxu0  ;;  %v699_v6 = vadd.f32 %v2666_v13, %v2662_v9  ;;  %v812_v15 = vmax.f32 %v711_v63, 0.0  ;;  %v721_v7 = vadd.f32 %v2700_v32, %v2658_v8  ;;  %v705_v13 = vadd.f32 %v2674_v25, %v2662_v9 }
 0x17c   : > { %v848_v17 = vpack.c.bf16 %v796_v14, %v794_v12  ;;  %v677_v23 = vadd.f32 %v676_v16, %v2658_v8  ;;  %v797_v37 = vmax.f32 %v675_v26, 0.0  ;;  %v2744_v12 = vpop.f32.mrf.mxu1  ;;  %v810_v14 = vmax.f32 %v707_v62, 0.0 }
 0x17d   : > { %v678_v20 = vpop.f32.mrf.mxu0  ;;  %v805_v16 = vmax.f32 %v695_v1, 0.0  ;;  %v814_v26 = vmax.f32 %v717_v46, 0.0  ;;  %v731_v32 = vadd.f32 %v2716_v10, %v2658_v8  ;;  %v715_v25 = vadd.f32 %v2686_v56, %v2662_v9 }
 0x17e   : > { %v679_v24 = vadd.f32 %v678_v20, %v2662_v9  ;;  %1155 = vmatprep.mubr.bf16.mxu1 %v848_v17  ;;  %v798_v34 = vmax.f32 %v677_v23, 0.0  ;;  %v807_v17 = vmax.f32 %v699_v6, 0.0  ;;  %v746_v31 = vpop.f32.mrf.mxu1  ;;  %v709_v23 = vadd.f32 %v2678_v36, %v2662_v9 }
 0x17f   : > { %v680_v27 = vpop.f32.mrf.mxu0  ;;  %1156 = vmatmul.mubr.bf16.gmra.mxu1 %v847_v19  ;;  %v856_v19 = vpack.c.bf16 %v812_v15, %v810_v14  ;;  %v719_v36 = vadd.f32 %v2694_v21, %v2662_v9  ;;  %v820_v40 = vmax.f32 %v731_v32, 0.0  ;;  %v741_v56 = vadd.f32 %v740_v55, %v2658_v8 }
 0x180   : > { %v681_v28 = vadd.f32 %v680_v27, %v2658_v8  ;;  %v799_v29 = vmax.f32 %v679_v24, 0.0  ;;  %v853_v20 = vpack.c.bf16 %v807_v17, %v805_v16  ;;  %v748_v24 = vpop.f32.mrf.mxu1  ;;  %v816_v27 = vmax.f32 %v721_v7, 0.0 }
 0x181   : > { %v684_v30 = vpop.f32.mrf.mxu0  ;;  %v725_v21 = vadd.f32 %v2702_v41, %v2662_v9  ;;  %v735_v41 = vadd.f32 %v2718_v22, %v2662_v9  ;;  %v745_v22 = vadd.f32 %v2744_v12, %v2662_v9  ;;  %v749_v17 = vadd.f32 %v748_v24, %v2662_v9 }
 0x182   : > { %v800_v35 = vmax.f32 %v681_v28, 0.0  ;;  %v849_v43 = vpack.c.bf16 %v799_v29, %v797_v37  ;;  %v685_v49 = vadd.f32 %v684_v30, %v2662_v9  ;;  %v809_v28 = vmax.f32 %v705_v13, 0.0  ;;  %v750_v30 = vpop.f32.mrf.mxu1 }
 0x183   : > { %v686_v38 = vpop.f32.mrf.mxu0  ;;  %v811_v29 = vmax.f32 %v709_v23, 0.0  ;;  %v817_v11 = vmax.f32 %v725_v21, 0.0  ;;  %v751_v55 = vadd.f32 %v750_v30, %v2658_v8  ;;  %v821_v63 = vmax.f32 %v735_v41, 0.0 }
 0x184   : > { %v850_v39 = vpack.c.bf16 %v800_v35, %v798_v34  ;;  %v687_v47 = vadd.f32 %v686_v38, %v2658_v8  ;;  %v801_v58 = vmax.f32 %v685_v49, 0.0  ;;  %v858_v34 = vpack.c.bf16 %v816_v27, %v814_v26  ;;  %v754_v37 = vpop.f32.mrf.mxu1  ;;  %v2223_v38 = vld [vmem:[#allocation8 + $0x40] sm:$0xff]  }
 0x185   : > { %v688_v44 = vpop.f32.mrf.mxu0  ;;  %v855_v35 = vpack.c.bf16 %v811_v29, %v809_v28  ;;  %1923 = vmatprep.subr.bf16.mxu0 %v2223_v38  ;;  %v729_v49 = vadd.f32 %v2710_v59, %v2662_v9  ;;  %v739_v59 = vadd.f32 %v2730_v45, %v2662_v9  ;;  %v828_v62 = vmax.f32 %v751_v55, 0.0 }
 0x186   : > { %v689_v48 = vadd.f32 %v688_v44, %v2662_v9  ;;  %1165 = vmatprep.mubr.bf16.mxu1 %v850_v39  ;;  %v802_v18 = vmax.f32 %v687_v47, 0.0  ;;  %v818_v39 = vmax.f32 %v727_v5, 0.0  ;;  %v815_v44 = vmax.f32 %v719_v36, 0.0  ;;  %v756_v50 = vpop.f32.mrf.mxu1  ;;  %1924 = vmatpush3.bf16.msra.mxu0 %v2224_v42 }
 0x187   : > { %v690_v51 = vpop.f32.mrf.mxu0  ;;  %1166 = vmatmul.mubr.bf16.gmra.mxu1 %v849_v43  ;;  %v813_v43 = vmax.f32 %v715_v25, 0.0  ;;  %v737_v47 = vadd.f32 %v2724_v33, %v2658_v8  ;;  %v747_v33 = vadd.f32 %v746_v31, %v2658_v8  ;;  %v823_v1 = vmax.f32 %v739_v59, 0.0 }
 0x188   : > { %v691_v53 = vadd.f32 %v690_v51, %v2658_v8  ;;  %v803_v54 = vmax.f32 %v689_v48, 0.0  ;;  %v860_v10 = vpack.c.bf16 %v820_v40, %v818_v39  ;;  %v758_v51 = vpop.f32.mrf.mxu1  ;;  %v757_v14 = vadd.f32 %v756_v50, %v2658_v8 }
 0x189   : > { %v857_v48 = vpack.c.bf16 %v815_v44, %v813_v43  ;;  %v822_v52 = vmax.f32 %v737_v47, 0.0  ;;  %v861_v16 = vpack.c.bf16 %v823_v1, %v821_v63  ;;  %v825_v46 = vmax.f32 %v745_v22, 0.0 }
 0x18a   : > { %v804_v57 = vmax.f32 %v691_v53, 0.0  ;;  %v851_v2 = vpack.c.bf16 %v803_v54, %v801_v58  ;;  %v824_v53 = vmax.f32 %v741_v56, 0.0  ;;  %v819_v54 = vmax.f32 %v729_v49, 0.0 }
 0x18b   : > { %v830_v31 = vmax.f32 %v757_v14, 0.0  ;;  %v827_v7 = vmax.f32 %v749_v17, 0.0  ;;  %v755_v28 = vadd.f32 %v754_v37, %v2662_v9  ;;  %v759_v12 = vadd.f32 %v758_v51, %v2662_v9  ;;  %v901_v37 = vld [vmem:[%s2986_s4] sm:$0x3] }
 0x18c   : > { %v852_v60 = vpack.c.bf16 %v804_v57, %v802_v18  ;;  %v760_v18 = vpop.f32.mrf.mxu1  ;;  %v862_v57 = vpack.c.bf16 %v824_v53, %v822_v52  ;;  %v859_v58 = vpack.c.bf16 %v819_v54, %v817_v11  ;;  %v2791_v40 = vrot.slane %v901_v37, %v400_v0 }
 0x18d   : > { %v761_v15 = vadd.f32 %v760_v18, %v2658_v8  ;;  %v863_v27 = vpack.c.bf16 %v827_v7, %v825_v46  ;;  %v829_v30 = vmax.f32 %v755_v28, 0.0  ;;  %v2795_v42 = vrot.slane %v901_v37, %v396_v4 }
 0x18e   : > { %1175 = vmatprep.mubr.bf16.mxu1 %v852_v60  ;;  %v764_v60 = vpop.f32.mrf.mxu1 }
 0x18f   : > { %1176 = vmatmul.mubr.bf16.gmra.mxu1 %v851_v2 }
 0x190   : > { %1185 = vmatprep.mubr.bf16.mxu1 %v854_v61  ;;  %v826_v61 = vmax.f32 %v747_v33, 0.0  ;;  %v766_v2 = vpop.f32.mrf.mxu1 }
 0x191   : > { %v767_v23 = vadd.f32 %v766_v2, %v2658_v8 }
 0x192   : > { %v864_v6 = vpack.c.bf16 %v828_v62, %v826_v61  ;;  %v768_v45 = vpop.f32.mrf.mxu1 }
 0x193   : > { %v834_v24 = vmax.f32 %v767_v23, 0.0  ;;  %v769_v25 = vadd.f32 %v768_v45, %v2662_v9 }
 0x195   : > { %v835_v36 = vmax.f32 %v769_v25, 0.0 }
 0x197   : > { %1186 = vmatmul.mubr.bf16.gmra.mxu1 %v853_v20  ;;  %v770_v20 = vpop.f32.mrf.mxu1 }
 0x198   : > { %1195 = vmatprep.mubr.bf16.mxu1 %v856_v19  ;;  %v832_v19 = vmax.f32 %v761_v15, 0.0  ;;  %v771_v26 = vadd.f32 %v770_v20, %v2658_v8 }
 0x19a   : > { %v866_v13 = vpack.c.bf16 %v832_v19, %v830_v31  ;;  %v836_v29 = vmax.f32 %v771_v26, 0.0 }
 0x19c   : > { %v868_v5 = vpack.c.bf16 %v836_v29, %v834_v24 }
 0x19f   : > { %1196 = vmatmul.mubr.bf16.gmra.mxu1 %v855_v35  ;;  %v765_v35 = vadd.f32 %v764_v60, %v2662_v9 }
 0x1a0   : > { %1205 = vmatprep.mubr.bf16.mxu1 %v858_v34  ;;  %v831_v34 = vmax.f32 %v759_v12, 0.0 }
 0x1a1   : > { %v833_v8 = vmax.f32 %v765_v35, 0.0 }
 0x1a2   : > { %v865_v32 = vpack.c.bf16 %v831_v34, %v829_v30 }
 0x1a3   : > { %v867_v38 = vpack.c.bf16 %v835_v36, %v833_v8 }
 0x1a7   : > { %1206 = vmatmul.mubr.bf16.gmra.mxu1 %v857_v48 }
 0x1a8   : > { %1215 = vmatprep.mubr.bf16.mxu1 %v860_v10 }
 0x1af   : > { %1216 = vmatmul.mubr.bf16.gmra.mxu1 %v859_v58 }
 0x1b0   : > { %1225 = vmatprep.mubr.bf16.mxu1 %v862_v57 }
 0x1b7   : > { %1226 = vmatmul.mubr.bf16.gmra.mxu1 %v861_v16 }
 0x1b8   : > { %1235 = vmatprep.mubr.bf16.mxu1 %v864_v6 }
 0x1bf   : > { %1236 = vmatmul.mubr.bf16.gmra.mxu1 %v863_v27 }
 0x1c0   : > { %1245 = vmatprep.mubr.bf16.mxu1 %v866_v13 }
 0x1c7   : > { %1246 = vmatmul.mubr.bf16.gmra.mxu1 %v865_v32 }
 0x1c8   : > { %1255 = vmatprep.mubr.bf16.mxu1 %v868_v5 }
 0x1cf   : > { %1256 = vmatmul.mubr.bf16.gmra.mxu1 %v867_v38 }
 0x217   : > { %v1107_v39 = vpop.f32.mrf.mxu1 }
 0x218   : > { %v1108_v10 = vadd.f32 %v1107_v39, %v2795_v42 }
 0x219   : > { %v1109_v9 = vpop.f32.mrf.mxu1 }
 0x21a   : > { %v1110_v44 = vadd.f32 %v1109_v9, %v2791_v40  ;;  %v1266_v51 = vmax.f32 %v1108_v10, 0.0 }
 0x21b   : > { %v1111_v43 = vpop.f32.mrf.mxu1 }
 0x21c   : > { %v1112_v50 = vadd.f32 %v1111_v43, %v2795_v42  ;;  %v1267_v49 = vmax.f32 %v1110_v44, 0.0 }
 0x21d   : > { %v1113_v47 = vpop.f32.mrf.mxu1 }
 0x21e   : > { %v1114_v56 = vadd.f32 %v1113_v47, %v2791_v40  ;;  %v1268_v48 = vmax.f32 %v1112_v50, 0.0 }
 0x21f   : > { %v1117_v21 = vpop.f32.mrf.mxu1 }
 0x220   : > { %v1269_v0 = vmax.f32 %v1114_v56, 0.0  ;;  %v1330_v4 = vpack.c.bf16 %v1268_v48, %v1266_v51  ;;  %v1118_v18 = vadd.f32 %v1117_v21, %v2795_v42 }
 0x221   : > { %v1119_v52 = vpop.f32.mrf.mxu1 }
 0x222   : > { %v1331_v3 = vpack.c.bf16 %v1269_v0, %v1267_v49  ;;  %v1120_v11 = vadd.f32 %v1119_v52, %v2791_v40  ;;  %v1270_v60 = vmax.f32 %v1118_v18, 0.0 }
 0x223   : > { %v1121_v53 = vpop.f32.mrf.mxu1 }
 0x224   : > { %v1122_v54 = vadd.f32 %v1121_v53, %v2795_v42  ;;  %1529 = vmatprep.mubr.bf16.mxu0 %v1331_v3  ;;  %v1271_v41 = vmax.f32 %v1120_v11, 0.0 }
 0x225   : > { %v1123_v57 = vpop.f32.mrf.mxu1  ;;  %1530 = vmatmul.mubr.bf16.vlgmr.msra.gmra.mxu0 %v1330_v4 }
 0x226   : > { %v1124_v33 = vadd.f32 %v1123_v57, %v2791_v40  ;;  %v1272_v55 = vmax.f32 %v1122_v54, 0.0 }
 0x227   : > { %v1127_v58 = vpop.f32.mrf.mxu1 }
 0x228   : > { %v1273_v59 = vmax.f32 %v1124_v33, 0.0  ;;  %v1332_v63 = vpack.c.bf16 %v1272_v55, %v1270_v60  ;;  %v1128_v14 = vadd.f32 %v1127_v58, %v2795_v42 }
 0x229   : > { %v1129_v61 = vpop.f32.mrf.mxu1 }
 0x22a   : > { %v1333_v62 = vpack.c.bf16 %v1273_v59, %v1271_v41  ;;  %v1130_v2 = vadd.f32 %v1129_v61, %v2791_v40  ;;  %v1274_v19 = vmax.f32 %v1128_v14, 0.0 }
 0x22b   : > { %v1131_v1 = vpop.f32.mrf.mxu1 }
 0x22c   : > { %v1132_v6 = vadd.f32 %v1131_v1, %v2795_v42  ;;  %1537 = vmatprep.mubr.bf16.mxu0 %v1333_v62  ;;  %v1275_v45 = vmax.f32 %v1130_v2, 0.0 }
 0x22d   : > { %v1133_v15 = vpop.f32.mrf.mxu1  ;;  %1538 = vmatmul.mubr.bf16.gmra.mxu0 %v1332_v63 }
 0x22e   : > { %v1134_v16 = vadd.f32 %v1133_v15, %v2791_v40  ;;  %v1276_v22 = vmax.f32 %v1132_v6, 0.0 }
 0x22f   : > { %v1137_v17 = vpop.f32.mrf.mxu1 }
 0x230   : > { %v1277_v31 = vmax.f32 %v1134_v16, 0.0  ;;  %v1334_v20 = vpack.c.bf16 %v1276_v22, %v1274_v19  ;;  %v1138_v27 = vadd.f32 %v1137_v17, %v2795_v42 }
 0x231   : > { %v1139_v46 = vpop.f32.mrf.mxu1 }
 0x232   : > { %v1335_v7 = vpack.c.bf16 %v1277_v31, %v1275_v45  ;;  %v1140_v23 = vadd.f32 %v1139_v46, %v2791_v40  ;;  %v1278_v5 = vmax.f32 %v1138_v27, 0.0 }
 0x233   : > { %v1141_v13 = vpop.f32.mrf.mxu1 }
 0x234   : > { %v1142_v26 = vadd.f32 %v1141_v13, %v2795_v42  ;;  %1545 = vmatprep.mubr.bf16.mxu0 %v1335_v7  ;;  %v1279_v30 = vmax.f32 %v1140_v23, 0.0 }
 0x235   : > { %v1143_v28 = vpop.f32.mrf.mxu1  ;;  %1546 = vmatmul.mubr.bf16.gmra.mxu0 %v1334_v20 }
 0x236   : > { %v1144_v12 = vadd.f32 %v1143_v28, %v2791_v40  ;;  %v1280_v24 = vmax.f32 %v1142_v26, 0.0 }
 0x237   : > { %v1147_v29 = vpop.f32.mrf.mxu1 }
 0x238   : > { %v1281_v34 = vmax.f32 %v1144_v12, 0.0  ;;  %v1336_v25 = vpack.c.bf16 %v1280_v24, %v1278_v5  ;;  %v1148_v37 = vadd.f32 %v1147_v29, %v2795_v42 }
 0x239   : > { %v1149_v32 = vpop.f32.mrf.mxu1 }
 0x23a   : > { %v1337_v35 = vpack.c.bf16 %v1281_v34, %v1279_v30  ;;  %v1150_v36 = vadd.f32 %v1149_v32, %v2791_v40  ;;  %v1282_v47 = vmax.f32 %v1148_v37, 0.0 }
 0x23b   : > { %v1151_v8 = vpop.f32.mrf.mxu1 }
 0x23c   : > { %v1152_v38 = vadd.f32 %v1151_v8, %v2795_v42  ;;  %1553 = vmatprep.mubr.bf16.mxu0 %v1337_v35  ;;  %v1283_v50 = vmax.f32 %v1150_v36, 0.0 }
 0x23d   : > { %v1153_v39 = vpop.f32.mrf.mxu1  ;;  %1554 = vmatmul.mubr.bf16.gmra.mxu0 %v1336_v25 }
 0x23e   : > { %v1154_v9 = vadd.f32 %v1153_v39, %v2791_v40  ;;  %v1284_v43 = vmax.f32 %v1152_v38, 0.0 }
 0x23f   : > { %v1157_v44 = vpop.f32.mrf.mxu1 }
 0x240   : > { %v1285_v10 = vmax.f32 %v1154_v9, 0.0  ;;  %v1338_v21 = vpack.c.bf16 %v1284_v43, %v1282_v47  ;;  %v1158_v52 = vadd.f32 %v1157_v44, %v2795_v42 }
 0x241   : > { %v1159_v56 = vpop.f32.mrf.mxu1 }
 0x242   : > { %v1339_v48 = vpack.c.bf16 %v1285_v10, %v1283_v50  ;;  %v1160_v0 = vadd.f32 %v1159_v56, %v2791_v40  ;;  %v1286_v57 = vmax.f32 %v1158_v52, 0.0 }
 0x243   : > { %v1161_v49 = vpop.f32.mrf.mxu1 }
 0x244   : > { %v1162_v51 = vadd.f32 %v1161_v49, %v2795_v42  ;;  %1561 = vmatprep.mubr.bf16.mxu0 %v1339_v48  ;;  %v1287_v54 = vmax.f32 %v1160_v0, 0.0 }
 0x245   : > { %v1163_v3 = vpop.f32.mrf.mxu1  ;;  %1562 = vmatmul.mubr.bf16.gmra.mxu0 %v1338_v21 }
 0x246   : > { %v1164_v4 = vadd.f32 %v1163_v3, %v2791_v40  ;;  %v1288_v53 = vmax.f32 %v1162_v51, 0.0 }
 0x247   : > { %v1167_v11 = vpop.f32.mrf.mxu1 }
 0x248   : > { %v1289_v18 = vmax.f32 %v1164_v4, 0.0  ;;  %v1340_v58 = vpack.c.bf16 %v1288_v53, %v1286_v57  ;;  %v1168_v61 = vadd.f32 %v1167_v11, %v2795_v42 }
 0x249   : > { %v1169_v33 = vpop.f32.mrf.mxu1 }
 0x24a   : > { %v1341_v55 = vpack.c.bf16 %v1289_v18, %v1287_v54  ;;  %v1170_v59 = vadd.f32 %v1169_v33, %v2791_v40  ;;  %v1290_v15 = vmax.f32 %v1168_v61, 0.0 }
 0x24b   : > { %v1171_v41 = vpop.f32.mrf.mxu1 }
 0x24c   : > { %v1172_v60 = vadd.f32 %v1171_v41, %v2795_v42  ;;  %1569 = vmatprep.mubr.bf16.mxu0 %v1341_v55  ;;  %v1291_v6 = vmax.f32 %v1170_v59, 0.0 }
 0x24d   : > { %v1173_v62 = vpop.f32.mrf.mxu1  ;;  %1570 = vmatmul.mubr.bf16.gmra.mxu0 %v1340_v58 }
 0x24e   : > { %v1174_v63 = vadd.f32 %v1173_v62, %v2791_v40  ;;  %v1292_v1 = vmax.f32 %v1172_v60, 0.0 }
 0x24f   : > { %v1177_v2 = vpop.f32.mrf.mxu1 }
 0x250   : > { %v1293_v14 = vmax.f32 %v1174_v63, 0.0  ;;  %v1342_v17 = vpack.c.bf16 %v1292_v1, %v1290_v15  ;;  %v1178_v46 = vadd.f32 %v1177_v2, %v2795_v42 }
 0x251   : > { %v1179_v16 = vpop.f32.mrf.mxu1 }
 0x252   : > { %v1343_v22 = vpack.c.bf16 %v1293_v14, %v1291_v6  ;;  %v1180_v31 = vadd.f32 %v1179_v16, %v2791_v40  ;;  %v1294_v28 = vmax.f32 %v1178_v46, 0.0 }
 0x253   : > { %v1181_v45 = vpop.f32.mrf.mxu1 }
 0x254   : > { %v1182_v19 = vadd.f32 %v1181_v45, %v2795_v42  ;;  %1577 = vmatprep.mubr.bf16.mxu0 %v1343_v22  ;;  %v1295_v26 = vmax.f32 %v1180_v31, 0.0 }
 0x255   : > { %v1183_v7 = vpop.f32.mrf.mxu1  ;;  %1578 = vmatmul.mubr.bf16.gmra.mxu0 %v1342_v17 }
 0x256   : > { %v1184_v20 = vadd.f32 %v1183_v7, %v2791_v40  ;;  %v1296_v13 = vmax.f32 %v1182_v19, 0.0 }
 0x257   : > { %v1187_v23 = vpop.f32.mrf.mxu1 }
 0x258   : > { %v1297_v27 = vmax.f32 %v1184_v20, 0.0  ;;  %v1344_v29 = vpack.c.bf16 %v1296_v13, %v1294_v28  ;;  %v1188_v32 = vadd.f32 %v1187_v23, %v2795_v42 }
 0x259   : > { %v1189_v12 = vpop.f32.mrf.mxu1 }
 0x25a   : > { %v1345_v24 = vpack.c.bf16 %v1297_v27, %v1295_v26  ;;  %v1190_v34 = vadd.f32 %v1189_v12, %v2791_v40  ;;  %v1298_v39 = vmax.f32 %v1188_v32, 0.0 }
 0x25b   : > { %v1191_v30 = vpop.f32.mrf.mxu1 }
 0x25c   : > { %v1192_v5 = vadd.f32 %v1191_v30, %v2795_v42  ;;  %1585 = vmatprep.mubr.bf16.mxu0 %v1345_v24  ;;  %v1299_v38 = vmax.f32 %v1190_v34, 0.0 }
 0x25d   : > { %v1193_v35 = vpop.f32.mrf.mxu1  ;;  %1586 = vmatmul.mubr.bf16.gmra.mxu0 %v1344_v29 }
 0x25e   : > { %v1194_v25 = vadd.f32 %v1193_v35, %v2791_v40  ;;  %v1300_v8 = vmax.f32 %v1192_v5, 0.0 }
 0x25f   : > { %v1197_v36 = vpop.f32.mrf.mxu1 }
 0x260   : > { %v1301_v37 = vmax.f32 %v1194_v25, 0.0  ;;  %v1346_v44 = vpack.c.bf16 %v1300_v8, %v1298_v39  ;;  %v1198_v56 = vadd.f32 %v1197_v36, %v2795_v42 }
 0x261   : > { %v1199_v9 = vpop.f32.mrf.mxu1 }
 0x262   : > { %v1347_v43 = vpack.c.bf16 %v1301_v37, %v1299_v38  ;;  %v1200_v10 = vadd.f32 %v1199_v9, %v2791_v40  ;;  %v1302_v3 = vmax.f32 %v1198_v56, 0.0 }
 0x263   : > { %v1201_v50 = vpop.f32.mrf.mxu1 }
 0x264   : > { %v1202_v47 = vadd.f32 %v1201_v50, %v2795_v42  ;;  %1593 = vmatprep.mubr.bf16.mxu0 %v1347_v43  ;;  %v1303_v51 = vmax.f32 %v1200_v10, 0.0 }
 0x265   : > { %v1203_v48 = vpop.f32.mrf.mxu1  ;;  %1594 = vmatmul.mubr.bf16.gmra.mxu0 %v1346_v44 }
 0x266   : > { %v1204_v21 = vadd.f32 %v1203_v48, %v2791_v40  ;;  %v1304_v49 = vmax.f32 %v1202_v47, 0.0 }
 0x267   : > { %v1207_v0 = vpop.f32.mrf.mxu1 }
 0x268   : > { %v1305_v52 = vmax.f32 %v1204_v21, 0.0  ;;  %v1348_v11 = vpack.c.bf16 %v1304_v49, %v1302_v3  ;;  %v1208_v33 = vadd.f32 %v1207_v0, %v2795_v42 }
 0x269   : > { %v1209_v4 = vpop.f32.mrf.mxu1 }
 0x26a   : > { %v1349_v53 = vpack.c.bf16 %v1305_v52, %v1303_v51  ;;  %v1210_v18 = vadd.f32 %v1209_v4, %v2791_v40  ;;  %v1306_v62 = vmax.f32 %v1208_v33, 0.0 }
 0x26b   : > { %v1211_v54 = vpop.f32.mrf.mxu1 }
 0x26c   : > { %v1212_v57 = vadd.f32 %v1211_v54, %v2795_v42  ;;  %1601 = vmatprep.mubr.bf16.mxu0 %v1349_v53  ;;  %v1307_v60 = vmax.f32 %v1210_v18, 0.0 }
 0x26d   : > { %v1213_v55 = vpop.f32.mrf.mxu1  ;;  %1602 = vmatmul.mubr.bf16.gmra.mxu0 %v1348_v11 }
 0x26e   : > { %v1214_v58 = vadd.f32 %v1213_v55, %v2791_v40  ;;  %v1308_v41 = vmax.f32 %v1212_v57, 0.0 }
 0x26f   : > { %v1217_v59 = vpop.f32.mrf.mxu1 }
 0x270   : > { %v1309_v61 = vmax.f32 %v1214_v58, 0.0  ;;  %v1350_v2 = vpack.c.bf16 %v1308_v41, %v1306_v62  ;;  %v1218_v16 = vadd.f32 %v1217_v59, %v2795_v42 }
 0x271   : > { %v1219_v63 = vpop.f32.mrf.mxu1 }
 0x272   : > { %v1351_v1 = vpack.c.bf16 %v1309_v61, %v1307_v60  ;;  %v1220_v14 = vadd.f32 %v1219_v63, %v2791_v40  ;;  %v1310_v7 = vmax.f32 %v1218_v16, 0.0 }
 0x273   : > { %v1221_v6 = vpop.f32.mrf.mxu1 }
 0x274   : > { %v1222_v15 = vadd.f32 %v1221_v6, %v2795_v42  ;;  %1609 = vmatprep.mubr.bf16.mxu0 %v1351_v1  ;;  %v1311_v19 = vmax.f32 %v1220_v14, 0.0 }
 0x275   : > { %v1223_v22 = vpop.f32.mrf.mxu1  ;;  %1610 = vmatmul.mubr.bf16.gmra.mxu0 %v1350_v2 }
 0x276   : > { %v1224_v17 = vadd.f32 %v1223_v22, %v2791_v40  ;;  %v1312_v45 = vmax.f32 %v1222_v15, 0.0 }
 0x277   : > { %v1227_v31 = vpop.f32.mrf.mxu1 }
 0x278   : > { %v1313_v46 = vmax.f32 %v1224_v17, 0.0  ;;  %v1352_v23 = vpack.c.bf16 %v1312_v45, %v1310_v7  ;;  %v1228_v12 = vadd.f32 %v1227_v31, %v2795_v42  ;;  %v2865_v31 = vld [vmem:[%s2988_s6] ss:$0 sm:$0xff] }
 0x279   : > { %v1229_v20 = vpop.f32.mrf.mxu1 }
 0x27a   : > { %v1353_v13 = vpack.c.bf16 %v1313_v46, %v1311_v19  ;;  %v1230_v27 = vadd.f32 %v1229_v20, %v2791_v40  ;;  %v1314_v35 = vmax.f32 %v1228_v12, 0.0 }
 0x27b   : > { %v1231_v26 = vpop.f32.mrf.mxu1 }
 0x27c   : > { %v1232_v28 = vadd.f32 %v1231_v26, %v2795_v42  ;;  %1617 = vmatprep.mubr.bf16.mxu0 %v1353_v13  ;;  %v1315_v5 = vmax.f32 %v1230_v27, 0.0 }
 0x27d   : > { %v1233_v24 = vpop.f32.mrf.mxu1  ;;  %1618 = vmatmul.mubr.bf16.gmra.mxu0 %v1352_v23 }
 0x27e   : > { %v1234_v29 = vadd.f32 %v1233_v24, %v2791_v40  ;;  %v1316_v30 = vmax.f32 %v1232_v28, 0.0 }
 0x27f   : > { %v1237_v34 = vpop.f32.mrf.mxu1 }
 0x280   : > { %v1317_v32 = vmax.f32 %v1234_v29, 0.0  ;;  %v1354_v36 = vpack.c.bf16 %v1316_v30, %v1314_v35  ;;  %v1238_v9 = vadd.f32 %v1237_v34, %v2795_v42 }
 0x281   : > { %v1239_v25 = vpop.f32.mrf.mxu1 }
 0x282   : > { %v1355_v8 = vpack.c.bf16 %v1317_v32, %v1315_v5  ;;  %v1240_v37 = vadd.f32 %v1239_v25, %v2791_v40  ;;  %v1318_v48 = vmax.f32 %v1238_v9, 0.0 }
 0x283   : > { %v1241_v38 = vpop.f32.mrf.mxu1 }
 0x284   : > { %v1242_v39 = vadd.f32 %v1241_v38, %v2795_v42  ;;  %1625 = vmatprep.mubr.bf16.mxu0 %v1355_v8  ;;  %v1319_v47 = vmax.f32 %v1240_v37, 0.0 }
 0x285   : > { %v1243_v43 = vpop.f32.mrf.mxu1  ;;  %1626 = vmatmul.mubr.bf16.gmra.mxu0 %v1354_v36 }
 0x286   : > { %v1244_v44 = vadd.f32 %v1243_v43, %v2791_v40  ;;  %v1320_v50 = vmax.f32 %v1242_v39, 0.0 }
 0x287   : > { %v1247_v10 = vpop.f32.mrf.mxu1 }
 0x288   : > { %v1321_v56 = vmax.f32 %v1244_v44, 0.0  ;;  %v1356_v0 = vpack.c.bf16 %v1320_v50, %v1318_v48  ;;  %v1248_v4 = vadd.f32 %v1247_v10, %v2795_v42 }
 0x289   : > { %v1249_v21 = vpop.f32.mrf.mxu1 }
 0x28a   : > { %v1357_v49 = vpack.c.bf16 %v1321_v56, %v1319_v47  ;;  %v1250_v52 = vadd.f32 %v1249_v21, %v2791_v40  ;;  %v1322_v55 = vmax.f32 %v1248_v4, 0.0 }
 0x28b   : > { %v1251_v51 = vpop.f32.mrf.mxu1 }
 0x28c   : > { %v1252_v3 = vadd.f32 %v1251_v51, %v2795_v42  ;;  %1633 = vmatprep.mubr.bf16.mxu0 %v1357_v49  ;;  %v1323_v57 = vmax.f32 %v1250_v52, 0.0 }
 0x28d   : > { %v1253_v53 = vpop.f32.mrf.mxu1  ;;  %1634 = vmatmul.mubr.bf16.gmra.mxu0 %v1356_v0 }
 0x28e   : > { %v1254_v11 = vadd.f32 %v1253_v53, %v2791_v40  ;;  %v1324_v54 = vmax.f32 %v1252_v3, 0.0 }
 0x28f   : > { %v1257_v18 = vpop.f32.mrf.mxu1 }
 0x290   : > { %v1325_v33 = vmax.f32 %v1254_v11, 0.0  ;;  %v1358_v59 = vpack.c.bf16 %v1324_v54, %v1322_v55  ;;  %v1258_v63 = vadd.f32 %v1257_v18, %v2795_v42 }
 0x291   : > { %v1259_v58 = vpop.f32.mrf.mxu1 }
 0x292   : > { %v1359_v41 = vpack.c.bf16 %v1325_v33, %v1323_v57  ;;  %v1260_v61 = vadd.f32 %v1259_v58, %v2791_v40  ;;  %v1326_v16 = vmax.f32 %v1258_v63, 0.0 }
 0x293   : > { %v1261_v60 = vpop.f32.mrf.mxu1 }
 0x294   : > { %v1262_v62 = vadd.f32 %v1261_v60, %v2795_v42  ;;  %1641 = vmatprep.mubr.bf16.mxu0 %v1359_v41  ;;  %v1327_v14 = vmax.f32 %v1260_v61, 0.0 }
 0x295   : > { %v1263_v1 = vpop.f32.mrf.mxu1  ;;  %1642 = vmatmul.mubr.bf16.gmra.mxu0 %v1358_v59 }
 0x296   : > { %v1264_v2 = vadd.f32 %v1263_v1, %v2791_v40  ;;  %v1328_v6 = vmax.f32 %v1262_v62, 0.0 }
 0x298   : > { %v1329_v15 = vmax.f32 %v1264_v2, 0.0  ;;  %v1360_v17 = vpack.c.bf16 %v1328_v6, %v1326_v16 }
 0x29a   : > { %v1361_v22 = vpack.c.bf16 %v1329_v15, %v1327_v14 }
 0x29c   : > { %1649 = vmatprep.mubr.bf16.mxu0 %v1361_v22 }
 0x29d   : > { %1650 = vmatmul.mubr.bf16.gmra.mxu0 %v1360_v17 }
 0x2e5   : > { %v1925_v45 = vpop.f32.mrf.mxu0 }
 0x2e7   : > { %v1926_v42 = vpop.f32.mrf.mxu0 }
 0x2e8   : > { %v1927_v19 = vadd.f32 %v1926_v42, %v1925_v45 }
 0x2e9   : > { %v1928_v46 = vpop.f32.mrf.mxu0 }
 0x2ea   : > { %v1532_v40 = vadd.f32 %v1927_v19, %v2865_v31 }
 0x2eb   : > { %v1929_v7 = vpop.f32.mrf.mxu0 }
 0x2ec   : > { %1658 = vst [vmem:[%s2868_s21] sm:$0xff] %v1532_v40  ;;  %v1930_v20 = vadd.f32 %v1929_v7, %v1928_v46 }
 0x2ed   : > { %v1931_v13 = vpop.f32.mrf.mxu0 }
 0x2ee   : > { %v1535_v23 = vadd.f32 %v1930_v20, %v2865_v31 }
 0x2ef   : > { %v1932_v26 = vpop.f32.mrf.mxu0 }
 0x2f0   : > { %1659 = vst [vmem:[%s2868_s21 + $0x8] sm:$0xff] %v1535_v23  ;;  %v1933_v27 = vadd.f32 %v1932_v26, %v1931_v13 }
 0x2f1   : > { %v1934_v28 = vpop.f32.mrf.mxu0 }
 0x2f2   : > { %v1540_v12 = vadd.f32 %v1933_v27, %v2865_v31 }
 0x2f3   : > { %v1935_v24 = vpop.f32.mrf.mxu0 }
 0x2f4   : > { %1660 = vst [vmem:[%s2868_s21 + $0x10] sm:$0xff] %v1540_v12  ;;  %v1936_v29 = vadd.f32 %v1935_v24, %v1934_v28 }
 0x2f5   : > { %v1937_v30 = vpop.f32.mrf.mxu0 }
 0x2f6   : > { %v1543_v34 = vadd.f32 %v1936_v29, %v2865_v31 }
 0x2f7   : > { %v1938_v5 = vpop.f32.mrf.mxu0 }
 0x2f8   : > { %1661 = vst [vmem:[%s2868_s21 + $0x18] sm:$0xff] %v1543_v34  ;;  %v1939_v32 = vadd.f32 %v1938_v5, %v1937_v30 }
 0x2f9   : > { %v1940_v35 = vpop.f32.mrf.mxu0 }
 0x2fa   : > { %v1548_v25 = vadd.f32 %v1939_v32, %v2865_v31 }
 0x2fb   : > { %v1941_v8 = vpop.f32.mrf.mxu0 }
 0x2fc   : > { %1662 = vst [vmem:[%s2868_s21 + $0x20] sm:$0xff] %v1548_v25  ;;  %v1942_v36 = vadd.f32 %v1941_v8, %v1940_v35 }
 0x2fd   : > { %v1943_v38 = vpop.f32.mrf.mxu0 }
 0x2fe   : > { %v1551_v37 = vadd.f32 %v1942_v36, %v2865_v31 }
 0x2ff   : > { %v1944_v39 = vpop.f32.mrf.mxu0 }
 0x300   : > { %1663 = vst [vmem:[%s2868_s21 + $0x28] sm:$0xff] %v1551_v37  ;;  %v1945_v9 = vadd.f32 %v1944_v39, %v1943_v38 }
 0x301   : > { %v1946_v43 = vpop.f32.mrf.mxu0 }
 0x302   : > { %v1556_v44 = vadd.f32 %v1945_v9, %v2865_v31 }
 0x303   : > { %v1947_v50 = vpop.f32.mrf.mxu0 }
 0x304   : > { %1664 = vst [vmem:[%s2868_s21 + $0x30] sm:$0xff] %v1556_v44  ;;  %v1948_v10 = vadd.f32 %v1947_v50, %v1946_v43 }
 0x305   : > { %v1949_v47 = vpop.f32.mrf.mxu0 }
 0x306   : > { %v1559_v56 = vadd.f32 %v1948_v10, %v2865_v31 }
 0x307   : > { %v1950_v48 = vpop.f32.mrf.mxu0 }
 0x308   : > { %1665 = vst [vmem:[%s2868_s21 + $0x38] sm:$0xff] %v1559_v56  ;;  %v1951_v21 = vadd.f32 %v1950_v48, %v1949_v47 }
 0x309   : > { %v1952_v49 = vpop.f32.mrf.mxu0 }
 0x30a   : > { %v1564_v0 = vadd.f32 %v1951_v21, %v2865_v31 }
 0x30b   : > { %v1953_v51 = vpop.f32.mrf.mxu0 }
 0x30c   : > { %1666 = vst [vmem:[%s2868_s21 + $0x40] sm:$0xff] %v1564_v0  ;;  %v1954_v52 = vadd.f32 %v1953_v51, %v1952_v49 }
 0x30d   : > { %v1955_v3 = vpop.f32.mrf.mxu0 }
 0x30e   : > { %v1567_v4 = vadd.f32 %v1954_v52, %v2865_v31 }
 0x30f   : > { %v1956_v53 = vpop.f32.mrf.mxu0 }
 0x310   : > { %1667 = vst [vmem:[%s2868_s21 + $0x48] sm:$0xff] %v1567_v4  ;;  %v1957_v11 = vadd.f32 %v1956_v53, %v1955_v3 }
 0x311   : > { %v1958_v54 = vpop.f32.mrf.mxu0 }
 0x312   : > { %v1572_v18 = vadd.f32 %v1957_v11, %v2865_v31 }
 0x313   : > { %v1959_v57 = vpop.f32.mrf.mxu0 }
 0x314   : > { %1668 = vst [vmem:[%s2868_s21 + $0x50] sm:$0xff] %v1572_v18  ;;  %v1960_v33 = vadd.f32 %v1959_v57, %v1958_v54 }
 0x315   : > { %v1961_v55 = vpop.f32.mrf.mxu0 }
 0x316   : > { %v1575_v58 = vadd.f32 %v1960_v33, %v2865_v31 }
 0x317   : > { %v1962_v41 = vpop.f32.mrf.mxu0 }
 0x318   : > { %1669 = vst [vmem:[%s2868_s21 + $0x58] sm:$0xff] %v1575_v58  ;;  %v1963_v59 = vadd.f32 %v1962_v41, %v1961_v55 }
 0x319   : > { %v1964_v60 = vpop.f32.mrf.mxu0 }
 0x31a   : > { %v1580_v61 = vadd.f32 %v1963_v59, %v2865_v31 }
 0x31b   : > { %v1965_v62 = vpop.f32.mrf.mxu0 }
 0x31c   : > { %1670 = vst [vmem:[%s2868_s21 + $0x60] sm:$0xff] %v1580_v61  ;;  %v1966_v63 = vadd.f32 %v1965_v62, %v1964_v60 }
 0x31d   : > { %v1967_v1 = vpop.f32.mrf.mxu0 }
 0x31e   : > { %v1583_v2 = vadd.f32 %v1966_v63, %v2865_v31 }
 0x31f   : > { %v1968_v6 = vpop.f32.mrf.mxu0 }
 0x320   : > { %1671 = vst [vmem:[%s2868_s21 + $0x68] sm:$0xff] %v1583_v2  ;;  %v1969_v14 = vadd.f32 %v1968_v6, %v1967_v1 }
 0x321   : > { %v1970_v15 = vpop.f32.mrf.mxu0 }
 0x322   : > { %v1588_v16 = vadd.f32 %v1969_v14, %v2865_v31 }
 0x323   : > { %v1971_v22 = vpop.f32.mrf.mxu0 }
 0x324   : > { %1672 = vst [vmem:[%s2868_s21 + $0x70] sm:$0xff] %v1588_v16  ;;  %v1972_v17 = vadd.f32 %v1971_v22, %v1970_v15 }
 0x325   : > { %v1973_v45 = vpop.f32.mrf.mxu0 }
 0x326   : > { %v1591_v42 = vadd.f32 %v1972_v17, %v2865_v31 }
 0x327   : > { %v1974_v19 = vpop.f32.mrf.mxu0 }
 0x328   : > { %1673 = vst [vmem:[%s2868_s21 + $0x78] sm:$0xff] %v1591_v42  ;;  %v1975_v46 = vadd.f32 %v1974_v19, %v1973_v45 }
 0x329   : > { %v1976_v40 = vpop.f32.mrf.mxu0 }
 0x32a   : > { %v1596_v7 = vadd.f32 %v1975_v46, %v2865_v31 }
 0x32b   : > { %v1977_v20 = vpop.f32.mrf.mxu0 }
 0x32c   : > { %1674 = vst [vmem:[%s2868_s21 + $0x80] sm:$0xff] %v1596_v7  ;;  %v1978_v13 = vadd.f32 %v1977_v20, %v1976_v40 }
 0x32d   : > { %v1979_v23 = vpop.f32.mrf.mxu0 }
 0x32e   : > { %v1599_v26 = vadd.f32 %v1978_v13, %v2865_v31 }
 0x32f   : > { %v1980_v27 = vpop.f32.mrf.mxu0 }
 0x330   : > { %1675 = vst [vmem:[%s2868_s21 + $0x88] sm:$0xff] %v1599_v26  ;;  %v1981_v28 = vadd.f32 %v1980_v27, %v1979_v23 }
 0x331   : > { %v1982_v12 = vpop.f32.mrf.mxu0 }
 0x332   : > { %v1604_v24 = vadd.f32 %v1981_v28, %v2865_v31 }
 0x333   : > { %v1983_v29 = vpop.f32.mrf.mxu0 }
 0x334   : > { %1676 = vst [vmem:[%s2868_s21 + $0x90] sm:$0xff] %v1604_v24  ;;  %v1984_v30 = vadd.f32 %v1983_v29, %v1982_v12 }
 0x335   : > { %v1985_v34 = vpop.f32.mrf.mxu0 }
 0x336   : > { %v1607_v5 = vadd.f32 %v1984_v30, %v2865_v31 }
 0x337   : > { %v1986_v32 = vpop.f32.mrf.mxu0 }
 0x338   : > { %1677 = vst [vmem:[%s2868_s21 + $0x98] sm:$0xff] %v1607_v5  ;;  %v1987_v35 = vadd.f32 %v1986_v32, %v1985_v34 }
 0x339   : > { %v1988_v25 = vpop.f32.mrf.mxu0 }
 0x33a   : > { %v1612_v8 = vadd.f32 %v1987_v35, %v2865_v31 }
 0x33b   : > { %v1989_v36 = vpop.f32.mrf.mxu0 }
 0x33c   : > { %1678 = vst [vmem:[%s2868_s21 + $0xa0] sm:$0xff] %v1612_v8  ;;  %v1990_v38 = vadd.f32 %v1989_v36, %v1988_v25 }
 0x33d   : > { %v1991_v37 = vpop.f32.mrf.mxu0 }
 0x33e   : > { %v1615_v39 = vadd.f32 %v1990_v38, %v2865_v31 }
 0x33f   : > { %v1992_v9 = vpop.f32.mrf.mxu0 }
 0x340   : > { %1679 = vst [vmem:[%s2868_s21 + $0xa8] sm:$0xff] %v1615_v39  ;;  %v1993_v43 = vadd.f32 %v1992_v9, %v1991_v37 }
 0x341   : > { %v1994_v44 = vpop.f32.mrf.mxu0 }
 0x342   : > { %v1620_v50 = vadd.f32 %v1993_v43, %v2865_v31 }
 0x343   : > { %v1995_v10 = vpop.f32.mrf.mxu0 }
 0x344   : > { %1680 = vst [vmem:[%s2868_s21 + $0xb0] sm:$0xff] %v1620_v50  ;;  %v1996_v47 = vadd.f32 %v1995_v10, %v1994_v44 }
 0x345   : > { %v1997_v56 = vpop.f32.mrf.mxu0 }
 0x346   : > { %v1623_v48 = vadd.f32 %v1996_v47, %v2865_v31 }
 0x347   : > { %v1998_v21 = vpop.f32.mrf.mxu0 }
 0x348   : > { %1681 = vst [vmem:[%s2868_s21 + $0xb8] sm:$0xff] %v1623_v48  ;;  %v1999_v49 = vadd.f32 %v1998_v21, %v1997_v56 }
 0x349   : > { %v2000_v0 = vpop.f32.mrf.mxu0 }
 0x34a   : > { %v1628_v51 = vadd.f32 %v1999_v49, %v2865_v31 }
 0x34b   : > { %v2001_v52 = vpop.f32.mrf.mxu0 }
 0x34c   : > { %1682 = vst [vmem:[%s2868_s21 + $0xc0] sm:$0xff] %v1628_v51  ;;  %v2002_v3 = vadd.f32 %v2001_v52, %v2000_v0 }
 0x34d   : > { %v2003_v4 = vpop.f32.mrf.mxu0 }
 0x34e   : > { %v1631_v53 = vadd.f32 %v2002_v3, %v2865_v31 }
 0x34f   : > { %v2004_v11 = vpop.f32.mrf.mxu0 }
 0x350   : > { %1683 = vst [vmem:[%s2868_s21 + $0xc8] sm:$0xff] %v1631_v53  ;;  %v2005_v54 = vadd.f32 %v2004_v11, %v2003_v4 }
 0x351   : > { %v2006_v18 = vpop.f32.mrf.mxu0 }
 0x352   : > { %v1636_v57 = vadd.f32 %v2005_v54, %v2865_v31 }
 0x353   : > { %v2007_v33 = vpop.f32.mrf.mxu0 }
 0x354   : > { %1684 = vst [vmem:[%s2868_s21 + $0xd0] sm:$0xff] %v1636_v57  ;;  %v2008_v55 = vadd.f32 %v2007_v33, %v2006_v18 }
 0x355   : > { %v2009_v58 = vpop.f32.mrf.mxu0 }
 0x356   : > { %v1639_v41 = vadd.f32 %v2008_v55, %v2865_v31 }
 0x357   : > { %v2010_v59 = vpop.f32.mrf.mxu0 }
 0x358   : > { %1685 = vst [vmem:[%s2868_s21 + $0xd8] sm:$0xff] %v1639_v41  ;;  %v2011_v60 = vadd.f32 %v2010_v59, %v2009_v58 }
 0x359   : > { %v2012_v61 = vpop.f32.mrf.mxu0 }
 0x35a   : > { %v1644_v62 = vadd.f32 %v2011_v60, %v2865_v31 }
 0x35b   : > { %v2013_v63 = vpop.f32.mrf.mxu0 }
 0x35c   : > { %1686 = vst [vmem:[%s2868_s21 + $0xe0] sm:$0xff] %v1644_v62  ;;  %v2014_v1 = vadd.f32 %v2013_v63, %v2012_v61 }
 0x35d   : > { %v2015_v2 = vpop.f32.mrf.mxu0 }
 0x35e   : > { %v1647_v6 = vadd.f32 %v2014_v1, %v2865_v31 }
 0x35f   : > { %v2016_v14 = vpop.f32.mrf.mxu0 }
 0x360   : > { %1687 = vst [vmem:[%s2868_s21 + $0xe8] sm:$0xff] %v1647_v6  ;;  %v2017_v15 = vadd.f32 %v2016_v14, %v2015_v2 }
 0x361   : > { %v2018_v16 = vpop.f32.mrf.mxu0 }
 0x362   : > { %v1652_v22 = vadd.f32 %v2017_v15, %v2865_v31 }
 0x363   : > { %v2019_v17 = vpop.f32.mrf.mxu0 }
 0x364   : > { %1688 = vst [vmem:[%s2868_s21 + $0xf0] sm:$0xff] %v1652_v22  ;;  %v2020_v45 = vadd.f32 %v2019_v17, %v2018_v16 }
 0x366   : > { %v1655_v42 = vadd.f32 %v2020_v45, %v2865_v31 }
 0x368   : > { %1689 = vst [vmem:[%s2868_s21 + $0xf8] sm:$0xff] %v1655_v42 }
 0x369   : > { %2344 = shalt.err (!%p2341_p9)
}
 0x36a   : > { %s2345_s15 = scalar_lea.hbm %s2936_s16, 4096  ;;  %s2349_s14 = scalar_lea.hbm %s2989_s7, 16384 }
 0x36b   : > { %p2346_p1 = scmp.ne.s32.totalorder %s2936_s16, %s2345_s15  ;;  %p2350_p10 = scmp.lt.s32.totalorder %s2936_s16, %s2989_s7 }
 0x36c   : > { %p2351_p12 = scmp.lt.s32.totalorder %s2349_s14, %s2345_s15 }
 0x36d   : > { %p2347_p8 = pnand %p2346_p1, %p3013_p6 }
 0x36e   : > { %p2352_p2 = por %p2351_p12, %p2350_p10 }
 0x36f   : > { %p2348_p5 = pneg %p2347_p8 }
 0x371   : > { %p2353_p4 = pnand %p2352_p2, %p2348_p5 }
 0x373   : > { %2356 = shalt.err (!%p2353_p4)
}
 0x374   : > { %s2415_s23 = smov 128   ;;  %s2416_s1 = smov 8  }
 0x375   : > { %2051 = dma.vmem_to_hbm [thread:$0]  (%p3013_p6), %s2938_s11, 4096, %s2936_s16, %s1691_s29, %s2415_s23, %s2415_s23, %s2416_s1  }
 0x376 PF: > { %p2078_p11 = scmp.ge.s32.totalorder %s2403_s27, 2  ;;  %s1719_s30 = sand.u32 1, %s2391_s24  }
 0x377   : > { %p3014_p13 = scmp.ne.s32.totalorder %s2998_s8, 0  ;;  %s1720_s28 = scalar_lea.sflag [#allocation4], %s1719_s30 }
 0x379   : > { %p2068_p3 = pnand %p2078_p11, %p3014_p13 }
 0x37b   : > { %p2069_p0 = pneg %p2068_p3 }
 0x37d   : > { %2386 = dma.done.wait (%p2069_p0), %s1720_s28, 4096  }
 0x37e   : > { %2388 = vsyncadd (%p2069_p0), %s1720_s28, 4294963200  ;;  %p22_p7 = scmp.ge.s32.totalorder %s2539_s17, 6   ;;  %s3015_s24 = smov %s2395_s25 }
 0x37f   : > { %s3016_s25 = smov %s2399_s26  ;;  %s3017_s26 = smov %s2549_s20 }
 0x380   : > { %s3018_s27 = smov %s2539_s17  ;;  %24 = sbr.rel (!%p22_p7) target bundleno = 9 (0x9), region = 105 }
 0x385   :  { %1725 = vsyncpa [#allocation3], 1 }
 0x386   :  { %1727 = vsyncpa [#allocation3 + $0x1], 1 }
 0x387   :  { %1728 = vsyncpa [#allocation6], 1 }
 0x388   :  { %1729 = vsyncpa [#allocation9], 1 }
 0x389   :  { %1730 = vsyncpa [#allocation4], 1 }
 0x38a   :  { %1732 = vsyncpa [#allocation4 + $0x1], 1 }

</bundles_post_ra>
